<compile_context>
chip_gen: v5e
topology: v5e:2x2
jax: 0.10.0
libtpu: 0.0.40
codegen_flags: <defaults>
</compile_context>

<pallas_src>
import functools

import jax
import jax.numpy as jnp
from jax.experimental import pallas as pl
from jax.experimental.pallas import tpu as pltpu

BN_EPS = 1e-5
GIN_EPS = 0.0  # DGL GINConv default init_eps=0, learn_eps=False
LANE = 128


def _fused_gin_kernel(a_ref, h_ref, w1_ref, w2_ref, p_ref, out_ref,
                      *, n_layers, inv_n):
    """All GIN layers fused, fully resident in VMEM (single grid point).

    p_ref packs the per-layer BN affine params: (L, 4, F) = [g1, be1, g2, be2].
    """
    a = a_ref[...]          # bf16, kept bf16 (exact for a binary adjacency)
    h = h_ref[...]          # f32

    for i in range(n_layers):  # static unroll; n_layers is small
        # --- GIN sum aggregation: agg[r] = sum_{j: j->r} h[j] on the MXU ---
        # bf16 x bf16 inputs with f32 accumulation (A exact, h rounded to bf16).
        agg = jnp.dot(a, h.astype(jnp.bfloat16),
                      preferred_element_type=jnp.float32)
        if GIN_EPS != 0.0:
            z = (1.0 + GIN_EPS) * h + agg
        else:
            z = h + agg

        # --- MLP.linear1 (bias omitted: exactly cancelled by training-mode BN) ---
        t = jnp.dot(z, w1_ref[i], preferred_element_type=jnp.float32)

        # --- MLP.batch_norm1: one-pass stats, folded affine (2 VPU passes) ---
        s = jnp.sum(t, axis=0, keepdims=True)
        ss = jnp.sum(t * t, axis=0, keepdims=True)
        mean = s * inv_n
        var = jnp.maximum(ss * inv_n - mean * mean, 0.0)
        scale = jax.lax.rsqrt(var + BN_EPS) * p_ref[i, 0:1]
        shift = p_ref[i, 1:2] - mean * scale
        # --- F.relu inside MLP ---
        t = jnp.maximum(t * scale + shift, 0.0)

        # --- MLP.linear2 (bias omitted, same reason) ---
        y = jnp.dot(t, w2_ref[i], preferred_element_type=jnp.float32)

        # --- MLP.batch_norm2 ---
        s = jnp.sum(y, axis=0, keepdims=True)
        ss = jnp.sum(y * y, axis=0, keepdims=True)
        mean = s * inv_n
        var = jnp.maximum(ss * inv_n - mean * mean, 0.0)
        scale = jax.lax.rsqrt(var + BN_EPS) * p_ref[i, 2:3]
        shift = p_ref[i, 3:4] - mean * scale
        y = y * scale + shift

        # --- inter-layer ReLU from FlexibleGIN.forward (skipped on last layer) ---
        if i != n_layers - 1:
            y = jnp.maximum(y, 0.0)
        h = y

    out_ref[...] = h  # lane-dense (N, F=128) store


def _round_up(x, m):
    return ((x + m - 1) // m) * m


def _pad2(x, rows, cols):
    return jnp.pad(x.astype(jnp.float32),
                   ((0, rows - x.shape[0]), (0, cols - x.shape[1])))


def flexible_gin_forward(adj, in_feat, layer_params, mode='node'):
    """Run all GIN layers in one fused Pallas call. adj[i, j] = 1 iff edge j->i."""
    if mode == 'graph':
        # TODO(synk): dgl.max_nodes per-graph segment max readout not implemented.
        raise NotImplementedError("mode='graph' readout not implemented")

    n, _ = in_feat.shape
    # TODO(synk): mask BN statistics to support node counts not divisible by 8.
    assert n % 8 == 0, "node count must be a multiple of 8 (sublane)"

    n_layers = len(layer_params)
    dims = [in_feat.shape[1]]
    for (w1, _, _, _, w2, _, _, _) in layer_params:
        dims += [w1.shape[1], w2.shape[1]]
    feat = _round_up(max(dims), LANE)          # single padded feature width
    out_dim = layer_params[-1][4].shape[1]

    # Stack + zero-pad all per-layer parameters into lane-dense slabs.
    # Linear biases are intentionally not shipped: training-mode BatchNorm
    # cancels any per-feature additive bias exactly.
    w1s = jnp.stack([_pad2(p[0], feat, feat) for p in layer_params])
    w2s = jnp.stack([_pad2(p[4], feat, feat) for p in layer_params])
    # One (L, 4, F) slab for [gamma1, beta1, gamma2, beta2] -> one DMA.
    params_slab = jnp.stack([
        jnp.concatenate([_pad2(p[2], 1, feat), _pad2(p[3], 1, feat),
                         _pad2(p[6], 1, feat), _pad2(p[7], 1, feat)], axis=0)
        for p in layer_params])

    h0 = _pad2(in_feat, n, feat)
    a_bf16 = adj.astype(jnp.bfloat16)          # exact: adjacency is binary

    # Advisory cost estimate (padded dims = what actually executes).
    flops = n_layers * (2 * n * n * feat + 4 * n * feat * feat)
    bytes_accessed = (a_bf16.size * 2 + h0.size * 4 + n * feat * 4
                      + (w1s.size + w2s.size) * 4 + params_slab.size * 4)
    cost = pl.CostEstimate(flops=flops,
                           transcendentals=2 * n_layers * feat,
                           bytes_accessed=bytes_accessed)

    # Resident footprint: bf16 A (no f32 upcast), h/z/t/y working set,
    # weight slabs, small params, plus headroom.
    vmem_need = (a_bf16.size * 2
                 + 5 * h0.size * 4
                 + 2 * (w1s.size + w2s.size) * 4
                 + 2 * params_slab.size * 4
                 + (2 << 20))
    cp_kwargs = {}
    if vmem_need > (16 << 20):            # smallest default scoped limit (v5e)
        try:
            phys_vmem = pltpu.get_tpu_info().vmem_capacity_bytes
        except Exception:
            phys_vmem = 64 << 20          # conservative (v7x per-TC capacity)
        vmem_cap = max(phys_vmem - (8 << 20), 16 << 20)
        cp_kwargs["vmem_limit_bytes"] = int(min(vmem_need, vmem_cap))
    compiler_params = pltpu.CompilerParams(**cp_kwargs) if cp_kwargs else None

    vmem_spec = pl.BlockSpec(memory_space=pltpu.MemorySpace.VMEM)
    kernel = functools.partial(_fused_gin_kernel,
                               n_layers=n_layers, inv_n=1.0 / n)
    out_padded = pl.pallas_call(
        kernel,
        out_shape=jax.ShapeDtypeStruct((n, feat), jnp.float32),
        in_specs=[vmem_spec] * 5,
        out_specs=vmem_spec,
        cost_estimate=cost,
        compiler_params=compiler_params,
    )(a_bf16, h0, w1s, w2s, params_slab)

    return out_padded[:, :out_dim]


def init_mlp_params(key, input_dim, hidden_dim, output_dim):
    """Deterministic synthetic parameters for one MLP (linear1/bn1/linear2/bn2)."""
    k1, k2, k3, k4 = jax.random.split(key, 4)
    # Weights stored as (in, out) so the kernel does x @ W directly
    # (PyTorch stores (out, in) and computes x @ W.T -- same math).
    w1 = (jax.random.normal(k1, (input_dim, hidden_dim), jnp.float32)
          * (1.0 / jnp.sqrt(input_dim)))
    b1 = (jax.random.normal(k2, (1, hidden_dim), jnp.float32) * 0.01)
    w2 = (jax.random.normal(k3, (hidden_dim, output_dim), jnp.float32)
          * (1.0 / jnp.sqrt(hidden_dim)))
    b2 = (jax.random.normal(k4, (1, output_dim), jnp.float32) * 0.01)
    # BatchNorm affine params: PyTorch default init gamma=1, beta=0.
    g1 = jnp.ones((1, hidden_dim), jnp.float32)
    be1 = jnp.zeros((1, hidden_dim), jnp.float32)
    g2 = jnp.ones((1, output_dim), jnp.float32)
    be2 = jnp.zeros((1, output_dim), jnp.float32)
    return (w1, b1, g1, be1, w2, b2, g2, be2)


def init_flexible_gin(key, in_feats, h_feats, num_classes, n_layers):
    keys = jax.random.split(key, n_layers)
    layers = []
    if n_layers == 1:
        layers.append(init_mlp_params(keys[0], in_feats, h_feats, num_classes))
    else:
        layers.append(init_mlp_params(keys[0], in_feats, h_feats, h_feats))
        for i in range(n_layers - 2):
            layers.append(init_mlp_params(keys[i + 1], h_feats, h_feats, h_feats))
        layers.append(init_mlp_params(keys[n_layers - 1], h_feats, h_feats,
                                      num_classes))
    return layers


if __name__ == "__main__":
    key = jax.random.PRNGKey(0)
    k_adj, k_feat, k_params = jax.random.split(key, 3)

    # Small deterministic synthetic graph.
    N = 128          # number of nodes
    IN_FEATS = 16
    H_FEATS = 32
    NUM_CLASSES = 8
    N_LAYERS = 3

    # Dense in-edge adjacency: A[i, j] = 1 iff edge j -> i.
    adj = jax.random.bernoulli(k_adj, p=0.05, shape=(N, N)).astype(jnp.float32)
    in_feat = jax.random.normal(k_feat, (N, IN_FEATS), jnp.float32)

    layer_params = init_flexible_gin(k_params, IN_FEATS, H_FEATS,
                                     NUM_CLASSES, N_LAYERS)

    out = flexible_gin_forward(adj, in_feat, layer_params, mode='node')
    out = jax.block_until_ready(out)
    assert out.shape == (N, NUM_CLASSES), out.shape
    assert out.dtype == jnp.float32
    assert bool(jnp.all(jnp.isfinite(out)))
    print("KERNEL_OK")
</pallas_src>

<mosaic_0001>
module attributes {stable_mosaic.version = 11 : i64} {
  func.func @_fused_gin_kernel(%arg0: memref<128x128xbf16, #tpu.memory_space<vmem>>, %arg1: memref<128x128xf32, #tpu.memory_space<vmem>>, %arg2: memref<3x128x128xf32, #tpu.memory_space<vmem>>, %arg3: memref<3x128x128xf32, #tpu.memory_space<vmem>>, %arg4: memref<3x4x128xf32, #tpu.memory_space<vmem>>, %arg5: memref<128x128xf32, #tpu.memory_space<vmem>>) attributes {dimension_semantics = [], scalar_prefetch = 0 : i64, scratch_operands = 0 : i64, tpu.core_type = #tpu.core_type<tc>} {
    %c0 = arith.constant 0 : index
    %c0_0 = arith.constant 0 : index
    %0 = vector.load %arg0[%c0, %c0_0] : memref<128x128xbf16, #tpu.memory_space<vmem>>, vector<128x128xbf16>
    %c0_1 = arith.constant 0 : index
    %c0_2 = arith.constant 0 : index
    %1 = vector.load %arg1[%c0_1, %c0_2] : memref<128x128xf32, #tpu.memory_space<vmem>>, vector<128x128xf32>
    %2 = arith.truncf %1 : vector<128x128xf32> to vector<128x128xbf16>
    %cst = arith.constant dense<0.000000e+00> : vector<128x128xf32>
    %3 = tpu.matmul %0, %2, %cst {dimension_numbers = #tpu.dot_dimension_numbers<[1], [0], [0], [1], [0, 0, 1, 1], [], []>} : vector<128x128xbf16>, vector<128x128xbf16>, vector<128x128xf32> -> vector<128x128xf32>
    %4 = arith.addf %1, %3 : vector<128x128xf32>
    %c0_3 = arith.constant 0 : index
    %c0_4 = arith.constant 0 : index
    %c0_5 = arith.constant 0 : index
    %5 = vector.load %arg2[%c0_3, %c0_4, %c0_5] : memref<3x128x128xf32, #tpu.memory_space<vmem>>, vector<1x128x128xf32>
    %6 = vector.shape_cast %5 : vector<1x128x128xf32> to vector<128x128xf32>
    %cst_6 = arith.constant dense<0.000000e+00> : vector<128x128xf32>
    %7 = tpu.matmul %4, %6, %cst_6 {dimension_numbers = #tpu.dot_dimension_numbers<[1], [0], [0], [1], [0, 0, 1, 1], [], []>} : vector<128x128xf32>, vector<128x128xf32>, vector<128x128xf32> -> vector<128x128xf32>
    %cst_7 = arith.constant dense<0.000000e+00> : vector<128xf32>
    %8 = vector.multi_reduction <add>, %7, %cst_7 [0] : vector<128x128xf32> to vector<128xf32>
    %9 = vector.shape_cast %8 : vector<128xf32> to vector<1x128xf32>
    %10 = arith.mulf %7, %7 : vector<128x128xf32>
    %cst_8 = arith.constant dense<0.000000e+00> : vector<128xf32>
    %11 = vector.multi_reduction <add>, %10, %cst_8 [0] : vector<128x128xf32> to vector<128xf32>
    %12 = vector.shape_cast %11 : vector<128xf32> to vector<1x128xf32>
    %cst_9 = arith.constant 7.812500e-03 : f32
    %13 = vector.broadcast %cst_9 : f32 to vector<1x128xf32>
    %14 = arith.mulf %9, %13 : vector<1x128xf32>
    %cst_10 = arith.constant 7.812500e-03 : f32
    %15 = vector.broadcast %cst_10 : f32 to vector<1x128xf32>
    %16 = arith.mulf %12, %15 : vector<1x128xf32>
    %17 = arith.mulf %14, %14 : vector<1x128xf32>
    %18 = arith.subf %16, %17 : vector<1x128xf32>
    %cst_11 = arith.constant 0.000000e+00 : f32
    %19 = vector.broadcast %cst_11 : f32 to vector<1x128xf32>
    %20 = arith.maximumf %18, %19 : vector<1x128xf32>
    %cst_12 = arith.constant 9.99999974E-6 : f32
    %21 = vector.broadcast %cst_12 : f32 to vector<1x128xf32>
    %22 = arith.addf %20, %21 : vector<1x128xf32>
    %23 = math.rsqrt %22 : vector<1x128xf32>
    %c0_13 = arith.constant 0 : index
    %c0_14 = arith.constant 0 : index
    %c0_15 = arith.constant 0 : index
    %24 = vector.load %arg4[%c0_13, %c0_14, %c0_15] : memref<3x4x128xf32, #tpu.memory_space<vmem>>, vector<1x1x128xf32>
    %25 = vector.shape_cast %24 : vector<1x1x128xf32> to vector<1x128xf32>
    %26 = arith.mulf %23, %25 : vector<1x128xf32>
    %c0_16 = arith.constant 0 : index
    %c1 = arith.constant 1 : index
    %c0_17 = arith.constant 0 : index
    %27 = vector.load %arg4[%c0_16, %c1, %c0_17] : memref<3x4x128xf32, #tpu.memory_space<vmem>>, vector<1x1x128xf32>
    %28 = vector.shape_cast %27 : vector<1x1x128xf32> to vector<1x128xf32>
    %29 = arith.mulf %14, %26 : vector<1x128xf32>
    %30 = arith.subf %28, %29 : vector<1x128xf32>
    %31 = vector.broadcast %26 : vector<1x128xf32> to vector<128x128xf32>
    %32 = arith.mulf %7, %31 : vector<128x128xf32>
    %33 = vector.broadcast %30 : vector<1x128xf32> to vector<128x128xf32>
    %34 = arith.addf %32, %33 : vector<128x128xf32>
    %cst_18 = arith.constant 0.000000e+00 : f32
    %35 = vector.broadcast %cst_18 : f32 to vector<128x128xf32>
    %36 = arith.maximumf %34, %35 : vector<128x128xf32>
    %c0_19 = arith.constant 0 : index
    %c0_20 = arith.constant 0 : index
    %c0_21 = arith.constant 0 : index
    %37 = vector.load %arg3[%c0_19, %c0_20, %c0_21] : memref<3x128x128xf32, #tpu.memory_space<vmem>>, vector<1x128x128xf32>
    %38 = vector.shape_cast %37 : vector<1x128x128xf32> to vector<128x128xf32>
    %cst_22 = arith.constant dense<0.000000e+00> : vector<128x128xf32>
    %39 = tpu.matmul %36, %38, %cst_22 {dimension_numbers = #tpu.dot_dimension_numbers<[1], [0], [0], [1], [0, 0, 1, 1], [], []>} : vector<128x128xf32>, vector<128x128xf32>, vector<128x128xf32> -> vector<128x128xf32>
    %cst_23 = arith.constant dense<0.000000e+00> : vector<128xf32>
    %40 = vector.multi_reduction <add>, %39, %cst_23 [0] : vector<128x128xf32> to vector<128xf32>
    %41 = vector.shape_cast %40 : vector<128xf32> to vector<1x128xf32>
    %42 = arith.mulf %39, %39 : vector<128x128xf32>
    %cst_24 = arith.constant dense<0.000000e+00> : vector<128xf32>
    %43 = vector.multi_reduction <add>, %42, %cst_24 [0] : vector<128x128xf32> to vector<128xf32>
    %44 = vector.shape_cast %43 : vector<128xf32> to vector<1x128xf32>
    %cst_25 = arith.constant 7.812500e-03 : f32
    %45 = vector.broadcast %cst_25 : f32 to vector<1x128xf32>
    %46 = arith.mulf %41, %45 : vector<1x128xf32>
    %cst_26 = arith.constant 7.812500e-03 : f32
    %47 = vector.broadcast %cst_26 : f32 to vector<1x128xf32>
    %48 = arith.mulf %44, %47 : vector<1x128xf32>
    %49 = arith.mulf %46, %46 : vector<1x128xf32>
    %50 = arith.subf %48, %49 : vector<1x128xf32>
    %cst_27 = arith.constant 0.000000e+00 : f32
    %51 = vector.broadcast %cst_27 : f32 to vector<1x128xf32>
    %52 = arith.maximumf %50, %51 : vector<1x128xf32>
    %cst_28 = arith.constant 9.99999974E-6 : f32
    %53 = vector.broadcast %cst_28 : f32 to vector<1x128xf32>
    %54 = arith.addf %52, %53 : vector<1x128xf32>
    %55 = math.rsqrt %54 : vector<1x128xf32>
    %c0_29 = arith.constant 0 : index
    %c2 = arith.constant 2 : index
    %c0_30 = arith.constant 0 : index
    %56 = vector.load %arg4[%c0_29, %c2, %c0_30] : memref<3x4x128xf32, #tpu.memory_space<vmem>>, vector<1x1x128xf32>
    %57 = vector.shape_cast %56 : vector<1x1x128xf32> to vector<1x128xf32>
    %58 = arith.mulf %55, %57 : vector<1x128xf32>
    %c0_31 = arith.constant 0 : index
    %c3 = arith.constant 3 : index
    %c0_32 = arith.constant 0 : index
    %59 = vector.load %arg4[%c0_31, %c3, %c0_32] : memref<3x4x128xf32, #tpu.memory_space<vmem>>, vector<1x1x128xf32>
    %60 = vector.shape_cast %59 : vector<1x1x128xf32> to vector<1x128xf32>
    %61 = arith.mulf %46, %58 : vector<1x128xf32>
    %62 = arith.subf %60, %61 : vector<1x128xf32>
    %63 = vector.broadcast %58 : vector<1x128xf32> to vector<128x128xf32>
    %64 = arith.mulf %39, %63 : vector<128x128xf32>
    %65 = vector.broadcast %62 : vector<1x128xf32> to vector<128x128xf32>
    %66 = arith.addf %64, %65 : vector<128x128xf32>
    %cst_33 = arith.constant 0.000000e+00 : f32
    %67 = vector.broadcast %cst_33 : f32 to vector<128x128xf32>
    %68 = arith.maximumf %66, %67 : vector<128x128xf32>
    %69 = arith.truncf %68 : vector<128x128xf32> to vector<128x128xbf16>
    %cst_34 = arith.constant dense<0.000000e+00> : vector<128x128xf32>
    %70 = tpu.matmul %0, %69, %cst_34 {dimension_numbers = #tpu.dot_dimension_numbers<[1], [0], [0], [1], [0, 0, 1, 1], [], []>} : vector<128x128xbf16>, vector<128x128xbf16>, vector<128x128xf32> -> vector<128x128xf32>
    %71 = arith.addf %68, %70 : vector<128x128xf32>
    %c1_35 = arith.constant 1 : index
    %c0_36 = arith.constant 0 : index
    %c0_37 = arith.constant 0 : index
    %72 = vector.load %arg2[%c1_35, %c0_36, %c0_37] : memref<3x128x128xf32, #tpu.memory_space<vmem>>, vector<1x128x128xf32>
    %73 = vector.shape_cast %72 : vector<1x128x128xf32> to vector<128x128xf32>
    %cst_38 = arith.constant dense<0.000000e+00> : vector<128x128xf32>
    %74 = tpu.matmul %71, %73, %cst_38 {dimension_numbers = #tpu.dot_dimension_numbers<[1], [0], [0], [1], [0, 0, 1, 1], [], []>} : vector<128x128xf32>, vector<128x128xf32>, vector<128x128xf32> -> vector<128x128xf32>
    %cst_39 = arith.constant dense<0.000000e+00> : vector<128xf32>
    %75 = vector.multi_reduction <add>, %74, %cst_39 [0] : vector<128x128xf32> to vector<128xf32>
    %76 = vector.shape_cast %75 : vector<128xf32> to vector<1x128xf32>
    %77 = arith.mulf %74, %74 : vector<128x128xf32>
    %cst_40 = arith.constant dense<0.000000e+00> : vector<128xf32>
    %78 = vector.multi_reduction <add>, %77, %cst_40 [0] : vector<128x128xf32> to vector<128xf32>
    %79 = vector.shape_cast %78 : vector<128xf32> to vector<1x128xf32>
    %cst_41 = arith.constant 7.812500e-03 : f32
    %80 = vector.broadcast %cst_41 : f32 to vector<1x128xf32>
    %81 = arith.mulf %76, %80 : vector<1x128xf32>
    %cst_42 = arith.constant 7.812500e-03 : f32
    %82 = vector.broadcast %cst_42 : f32 to vector<1x128xf32>
    %83 = arith.mulf %79, %82 : vector<1x128xf32>
    %84 = arith.mulf %81, %81 : vector<1x128xf32>
    %85 = arith.subf %83, %84 : vector<1x128xf32>
    %cst_43 = arith.constant 0.000000e+00 : f32
    %86 = vector.broadcast %cst_43 : f32 to vector<1x128xf32>
    %87 = arith.maximumf %85, %86 : vector<1x128xf32>
    %cst_44 = arith.constant 9.99999974E-6 : f32
    %88 = vector.broadcast %cst_44 : f32 to vector<1x128xf32>
    %89 = arith.addf %87, %88 : vector<1x128xf32>
    %90 = math.rsqrt %89 : vector<1x128xf32>
    %c1_45 = arith.constant 1 : index
    %c0_46 = arith.constant 0 : index
    %c0_47 = arith.constant 0 : index
    %91 = vector.load %arg4[%c1_45, %c0_46, %c0_47] : memref<3x4x128xf32, #tpu.memory_space<vmem>>, vector<1x1x128xf32>
    %92 = vector.shape_cast %91 : vector<1x1x128xf32> to vector<1x128xf32>
    %93 = arith.mulf %90, %92 : vector<1x128xf32>
    %c1_48 = arith.constant 1 : index
    %c1_49 = arith.constant 1 : index
    %c0_50 = arith.constant 0 : index
    %94 = vector.load %arg4[%c1_48, %c1_49, %c0_50] : memref<3x4x128xf32, #tpu.memory_space<vmem>>, vector<1x1x128xf32>
    %95 = vector.shape_cast %94 : vector<1x1x128xf32> to vector<1x128xf32>
    %96 = arith.mulf %81, %93 : vector<1x128xf32>
    %97 = arith.subf %95, %96 : vector<1x128xf32>
    %98 = vector.broadcast %93 : vector<1x128xf32> to vector<128x128xf32>
    %99 = arith.mulf %74, %98 : vector<128x128xf32>
    %100 = vector.broadcast %97 : vector<1x128xf32> to vector<128x128xf32>
    %101 = arith.addf %99, %100 : vector<128x128xf32>
    %cst_51 = arith.constant 0.000000e+00 : f32
    %102 = vector.broadcast %cst_51 : f32 to vector<128x128xf32>
    %103 = arith.maximumf %101, %102 : vector<128x128xf32>
    %c1_52 = arith.constant 1 : index
    %c0_53 = arith.constant 0 : index
    %c0_54 = arith.constant 0 : index
    %104 = vector.load %arg3[%c1_52, %c0_53, %c0_54] : memref<3x128x128xf32, #tpu.memory_space<vmem>>, vector<1x128x128xf32>
    %105 = vector.shape_cast %104 : vector<1x128x128xf32> to vector<128x128xf32>
    %cst_55 = arith.constant dense<0.000000e+00> : vector<128x128xf32>
    %106 = tpu.matmul %103, %105, %cst_55 {dimension_numbers = #tpu.dot_dimension_numbers<[1], [0], [0], [1], [0, 0, 1, 1], [], []>} : vector<128x128xf32>, vector<128x128xf32>, vector<128x128xf32> -> vector<128x128xf32>
    %cst_56 = arith.constant dense<0.000000e+00> : vector<128xf32>
    %107 = vector.multi_reduction <add>, %106, %cst_56 [0] : vector<128x128xf32> to vector<128xf32>
    %108 = vector.shape_cast %107 : vector<128xf32> to vector<1x128xf32>
    %109 = arith.mulf %106, %106 : vector<128x128xf32>
    %cst_57 = arith.constant dense<0.000000e+00> : vector<128xf32>
    %110 = vector.multi_reduction <add>, %109, %cst_57 [0] : vector<128x128xf32> to vector<128xf32>
    %111 = vector.shape_cast %110 : vector<128xf32> to vector<1x128xf32>
    %cst_58 = arith.constant 7.812500e-03 : f32
    %112 = vector.broadcast %cst_58 : f32 to vector<1x128xf32>
    %113 = arith.mulf %108, %112 : vector<1x128xf32>
    %cst_59 = arith.constant 7.812500e-03 : f32
    %114 = vector.broadcast %cst_59 : f32 to vector<1x128xf32>
    %115 = arith.mulf %111, %114 : vector<1x128xf32>
    %116 = arith.mulf %113, %113 : vector<1x128xf32>
    %117 = arith.subf %115, %116 : vector<1x128xf32>
    %cst_60 = arith.constant 0.000000e+00 : f32
    %118 = vector.broadcast %cst_60 : f32 to vector<1x128xf32>
    %119 = arith.maximumf %117, %118 : vector<1x128xf32>
    %cst_61 = arith.constant 9.99999974E-6 : f32
    %120 = vector.broadcast %cst_61 : f32 to vector<1x128xf32>
    %121 = arith.addf %119, %120 : vector<1x128xf32>
    %122 = math.rsqrt %121 : vector<1x128xf32>
    %c1_62 = arith.constant 1 : index
    %c2_63 = arith.constant 2 : index
    %c0_64 = arith.constant 0 : index
    %123 = vector.load %arg4[%c1_62, %c2_63, %c0_64] : memref<3x4x128xf32, #tpu.memory_space<vmem>>, vector<1x1x128xf32>
    %124 = vector.shape_cast %123 : vector<1x1x128xf32> to vector<1x128xf32>
    %125 = arith.mulf %122, %124 : vector<1x128xf32>
    %c1_65 = arith.constant 1 : index
    %c3_66 = arith.constant 3 : index
    %c0_67 = arith.constant 0 : index
    %126 = vector.load %arg4[%c1_65, %c3_66, %c0_67] : memref<3x4x128xf32, #tpu.memory_space<vmem>>, vector<1x1x128xf32>
    %127 = vector.shape_cast %126 : vector<1x1x128xf32> to vector<1x128xf32>
    %128 = arith.mulf %113, %125 : vector<1x128xf32>
    %129 = arith.subf %127, %128 : vector<1x128xf32>
    %130 = vector.broadcast %125 : vector<1x128xf32> to vector<128x128xf32>
    %131 = arith.mulf %106, %130 : vector<128x128xf32>
    %132 = vector.broadcast %129 : vector<1x128xf32> to vector<128x128xf32>
    %133 = arith.addf %131, %132 : vector<128x128xf32>
    %cst_68 = arith.constant 0.000000e+00 : f32
    %134 = vector.broadcast %cst_68 : f32 to vector<128x128xf32>
    %135 = arith.maximumf %133, %134 : vector<128x128xf32>
    %136 = arith.truncf %135 : vector<128x128xf32> to vector<128x128xbf16>
    %cst_69 = arith.constant dense<0.000000e+00> : vector<128x128xf32>
    %137 = tpu.matmul %0, %136, %cst_69 {dimension_numbers = #tpu.dot_dimension_numbers<[1], [0], [0], [1], [0, 0, 1, 1], [], []>} : vector<128x128xbf16>, vector<128x128xbf16>, vector<128x128xf32> -> vector<128x128xf32>
    %138 = arith.addf %135, %137 : vector<128x128xf32>
    %c2_70 = arith.constant 2 : index
    %c0_71 = arith.constant 0 : index
    %c0_72 = arith.constant 0 : index
    %139 = vector.load %arg2[%c2_70, %c0_71, %c0_72] : memref<3x128x128xf32, #tpu.memory_space<vmem>>, vector<1x128x128xf32>
    %140 = vector.shape_cast %139 : vector<1x128x128xf32> to vector<128x128xf32>
    %cst_73 = arith.constant dense<0.000000e+00> : vector<128x128xf32>
    %141 = tpu.matmul %138, %140, %cst_73 {dimension_numbers = #tpu.dot_dimension_numbers<[1], [0], [0], [1], [0, 0, 1, 1], [], []>} : vector<128x128xf32>, vector<128x128xf32>, vector<128x128xf32> -> vector<128x128xf32>
    %cst_74 = arith.constant dense<0.000000e+00> : vector<128xf32>
    %142 = vector.multi_reduction <add>, %141, %cst_74 [0] : vector<128x128xf32> to vector<128xf32>
    %143 = vector.shape_cast %142 : vector<128xf32> to vector<1x128xf32>
    %144 = arith.mulf %141, %141 : vector<128x128xf32>
    %cst_75 = arith.constant dense<0.000000e+00> : vector<128xf32>
    %145 = vector.multi_reduction <add>, %144, %cst_75 [0] : vector<128x128xf32> to vector<128xf32>
    %146 = vector.shape_cast %145 : vector<128xf32> to vector<1x128xf32>
    %cst_76 = arith.constant 7.812500e-03 : f32
    %147 = vector.broadcast %cst_76 : f32 to vector<1x128xf32>
    %148 = arith.mulf %143, %147 : vector<1x128xf32>
    %cst_77 = arith.constant 7.812500e-03 : f32
    %149 = vector.broadcast %cst_77 : f32 to vector<1x128xf32>
    %150 = arith.mulf %146, %149 : vector<1x128xf32>
    %151 = arith.mulf %148, %148 : vector<1x128xf32>
    %152 = arith.subf %150, %151 : vector<1x128xf32>
    %cst_78 = arith.constant 0.000000e+00 : f32
    %153 = vector.broadcast %cst_78 : f32 to vector<1x128xf32>
    %154 = arith.maximumf %152, %153 : vector<1x128xf32>
    %cst_79 = arith.constant 9.99999974E-6 : f32
    %155 = vector.broadcast %cst_79 : f32 to vector<1x128xf32>
    %156 = arith.addf %154, %155 : vector<1x128xf32>
    %157 = math.rsqrt %156 : vector<1x128xf32>
    %c2_80 = arith.constant 2 : index
    %c0_81 = arith.constant 0 : index
    %c0_82 = arith.constant 0 : index
    %158 = vector.load %arg4[%c2_80, %c0_81, %c0_82] : memref<3x4x128xf32, #tpu.memory_space<vmem>>, vector<1x1x128xf32>
    %159 = vector.shape_cast %158 : vector<1x1x128xf32> to vector<1x128xf32>
    %160 = arith.mulf %157, %159 : vector<1x128xf32>
    %c2_83 = arith.constant 2 : index
    %c1_84 = arith.constant 1 : index
    %c0_85 = arith.constant 0 : index
    %161 = vector.load %arg4[%c2_83, %c1_84, %c0_85] : memref<3x4x128xf32, #tpu.memory_space<vmem>>, vector<1x1x128xf32>
    %162 = vector.shape_cast %161 : vector<1x1x128xf32> to vector<1x128xf32>
    %163 = arith.mulf %148, %160 : vector<1x128xf32>
    %164 = arith.subf %162, %163 : vector<1x128xf32>
    %165 = vector.broadcast %160 : vector<1x128xf32> to vector<128x128xf32>
    %166 = arith.mulf %141, %165 : vector<128x128xf32>
    %167 = vector.broadcast %164 : vector<1x128xf32> to vector<128x128xf32>
    %168 = arith.addf %166, %167 : vector<128x128xf32>
    %cst_86 = arith.constant 0.000000e+00 : f32
    %169 = vector.broadcast %cst_86 : f32 to vector<128x128xf32>
    %170 = arith.maximumf %168, %169 : vector<128x128xf32>
    %c2_87 = arith.constant 2 : index
    %c0_88 = arith.constant 0 : index
    %c0_89 = arith.constant 0 : index
    %171 = vector.load %arg3[%c2_87, %c0_88, %c0_89] : memref<3x128x128xf32, #tpu.memory_space<vmem>>, vector<1x128x128xf32>
    %172 = vector.shape_cast %171 : vector<1x128x128xf32> to vector<128x128xf32>
    %cst_90 = arith.constant dense<0.000000e+00> : vector<128x128xf32>
    %173 = tpu.matmul %170, %172, %cst_90 {dimension_numbers = #tpu.dot_dimension_numbers<[1], [0], [0], [1], [0, 0, 1, 1], [], []>} : vector<128x128xf32>, vector<128x128xf32>, vector<128x128xf32> -> vector<128x128xf32>
    %cst_91 = arith.constant dense<0.000000e+00> : vector<128xf32>
    %174 = vector.multi_reduction <add>, %173, %cst_91 [0] : vector<128x128xf32> to vector<128xf32>
    %175 = vector.shape_cast %174 : vector<128xf32> to vector<1x128xf32>
    %176 = arith.mulf %173, %173 : vector<128x128xf32>
    %cst_92 = arith.constant dense<0.000000e+00> : vector<128xf32>
    %177 = vector.multi_reduction <add>, %176, %cst_92 [0] : vector<128x128xf32> to vector<128xf32>
    %178 = vector.shape_cast %177 : vector<128xf32> to vector<1x128xf32>
    %cst_93 = arith.constant 7.812500e-03 : f32
    %179 = vector.broadcast %cst_93 : f32 to vector<1x128xf32>
    %180 = arith.mulf %175, %179 : vector<1x128xf32>
    %cst_94 = arith.constant 7.812500e-03 : f32
    %181 = vector.broadcast %cst_94 : f32 to vector<1x128xf32>
    %182 = arith.mulf %178, %181 : vector<1x128xf32>
    %183 = arith.mulf %180, %180 : vector<1x128xf32>
    %184 = arith.subf %182, %183 : vector<1x128xf32>
    %cst_95 = arith.constant 0.000000e+00 : f32
    %185 = vector.broadcast %cst_95 : f32 to vector<1x128xf32>
    %186 = arith.maximumf %184, %185 : vector<1x128xf32>
    %cst_96 = arith.constant 9.99999974E-6 : f32
    %187 = vector.broadcast %cst_96 : f32 to vector<1x128xf32>
    %188 = arith.addf %186, %187 : vector<1x128xf32>
    %189 = math.rsqrt %188 : vector<1x128xf32>
    %c2_97 = arith.constant 2 : index
    %c2_98 = arith.constant 2 : index
    %c0_99 = arith.constant 0 : index
    %190 = vector.load %arg4[%c2_97, %c2_98, %c0_99] : memref<3x4x128xf32, #tpu.memory_space<vmem>>, vector<1x1x128xf32>
    %191 = vector.shape_cast %190 : vector<1x1x128xf32> to vector<1x128xf32>
    %192 = arith.mulf %189, %191 : vector<1x128xf32>
    %c2_100 = arith.constant 2 : index
    %c3_101 = arith.constant 3 : index
    %c0_102 = arith.constant 0 : index
    %193 = vector.load %arg4[%c2_100, %c3_101, %c0_102] : memref<3x4x128xf32, #tpu.memory_space<vmem>>, vector<1x1x128xf32>
    %194 = vector.shape_cast %193 : vector<1x1x128xf32> to vector<1x128xf32>
    %195 = arith.mulf %180, %192 : vector<1x128xf32>
    %196 = arith.subf %194, %195 : vector<1x128xf32>
    %197 = vector.broadcast %192 : vector<1x128xf32> to vector<128x128xf32>
    %198 = arith.mulf %173, %197 : vector<128x128xf32>
    %199 = vector.broadcast %196 : vector<1x128xf32> to vector<128x128xf32>
    %200 = arith.addf %198, %199 : vector<128x128xf32>
    %c0_103 = arith.constant 0 : index
    %c0_104 = arith.constant 0 : index
    %201 = vector.load %arg5[%c0_103, %c0_104] : memref<128x128xf32, #tpu.memory_space<vmem>>, vector<128x128xf32>
    tpu.vector_store %arg5[%c0_103, %c0_104], %200 {strides = array<i32>} : memref<128x128xf32, #tpu.memory_space<vmem>>, vector<128x128xf32>,
    return
  }
}

</mosaic_0001>

<bundles_post_ra>
// kernel: tpu_custom_call.1
= control target key start
LH: loop header
LB: loop body
LE: loop exit
PB: predicated region body
PF: predicated region fallthrough
CT: control target
= control target key end

     0   :  { %10 = vsyncpa [#allocation3], 0  ;;  %s2827_s0 = inlined_call_operand.hbm [shape: bf16[128,128], index: 0, kind: input, shape index: {}]   ;;  %s2828_s1 = inlined_call_operand.hbm [shape: f32[128,128], index: 1, kind: input, shape index: {}]   ;;  %s2829_s2 = inlined_call_operand.hbm [shape: f32[3,128,128], index: 2, kind: input, shape index: {}]   ;;  %s2830_s3 = inlined_call_operand.hbm [shape: f32[3,128,128], index: 3, kind: input, shape index: {}]   ;;  %s2831_s4 = inlined_call_operand.hbm [shape: f32[3,4,128], index: 4, kind: input, shape index: {}]   ;;  %s2832_s5 = inlined_call_operand.hbm [shape: f32[128,128], index: 5, kind: output, shape index: {}]  }
   0x1   :  { %11 = vsyncpa [#allocation6], 0 }
   0x2   :  { %12 = vsyncpa [#allocation9], 0  ;;  %s31_s20 = sshll.u32 %s2828_s1, 4  ;;  %s32_s20 = int_to_ptr.hbm [resolvable:$true] %s31_s20 }
   0x3   :  { %13 = vsyncpa [#allocation4], 0  ;;  %s1931_s21 = smov [#allocation5]   ;;  %s57_s25 = sshll.u32 %s2830_s3, 4  ;;  %s58_s25 = int_to_ptr.hbm [resolvable:$true] %s57_s25 }
   0x4   :  { %s33_s22 = sshll.u32 %s1931_s21, 4  ;;  %s1932_s26 = smov 128   ;;  %s34_s22 = int_to_ptr.vmem [resolvable:$true] %s33_s22 }
   0x5   :  { %s1933_s27 = smov 8   ;;  %s1934_s28 = smov [#allocation8]  }
   0x6   :  { %39 = dma.hbm_to_vmem [thread:$0]  %s32_s20, 2048, %s34_s22, [#allocation6], %s1932_s26, %s1932_s26, %s1933_s27  }
   0x7   :  { %s59_s29 = sshll.u32 %s1934_s28, 4  ;;  %s18_s6 = sshll.u32 %s2827_s0, 4  ;;  %s60_s29 = int_to_ptr.vmem [resolvable:$true] %s59_s29  ;;  %s19_s6 = int_to_ptr.hbm [resolvable:$true] %s18_s6 }
   0x8   :  { %65 = dma.hbm_to_vmem [thread:$0]  %s58_s25, 6144, %s60_s29, [#allocation9], %s1932_s26, %s1932_s26, %s1933_s27  }
   0x9   :  { %s1935_s3 = smov [#allocation2]   ;;  %s44_s10 = sshll.u32 %s2829_s2, 4  ;;  %s45_s10 = int_to_ptr.hbm [resolvable:$true] %s44_s10 }
   0xa   :  { %s20_s7 = sshll.u32 %s1935_s3, 4  ;;  %s1936_s11 = smov 64   ;;  %s21_s7 = int_to_ptr.vmem [resolvable:$true] %s20_s7 }
   0xb   :  { %s1937_s12 = smov 4   ;;  %s1938_s13 = smov [#allocation7]  }
   0xc   :  { %26 = dma.hbm_to_vmem [thread:$0]  %s19_s6, 1024, %s21_s7, [#allocation3], %s1936_s11, %s1936_s11, %s1937_s12  }
   0xd   :  { %s46_s14 = sshll.u32 %s1938_s13, 4  ;;  %s70_s16 = sshll.u32 %s2831_s4, 4  ;;  %s47_s14 = int_to_ptr.vmem [resolvable:$true] %s46_s14  ;;  %s71_s16 = int_to_ptr.hbm [resolvable:$true] %s70_s16 }
   0xe   :  { %52 = dma.hbm_to_vmem [thread:$0]  %s45_s10, 6144, %s47_s14, [#allocation6], %s1932_s26, %s1932_s26, %s1933_s27  }
   0xf   :  { %s1939_s17 = smov [#allocation10]  }
  0x10   :  { %s72_s18 = sshll.u32 %s1939_s17, 4  ;;  %s73_s18 = int_to_ptr.vmem [resolvable:$true] %s72_s18 }
  0x11   :  { %78 = dma.hbm_to_vmem [thread:$0]  %s71_s16, 192, %s73_s18, [#allocation9], %s1936_s11, %s1936_s11, %s1937_s12  }
  0x12   :  { %1923 = dma.done.wait [#allocation3], 1024  }
  0x13   :  { %1924 = vsyncadd [#allocation3], 4294966272 }
  0x14   :  { %1925 = dma.done.wait [#allocation6], 8192  }
  0x15   :  { %1926 = vsyncadd [#allocation6], 4294959104 }
  0x16   :  { %1927 = dma.done.wait [#allocation9], 6336  }
  0x17   :  { %1928 = vsyncadd [#allocation9], 4294960960  ;;  %v1995_v0 = vld [vmem:[#allocation5 + $0x70] sm:$0xff]  ;;  %v1997_v1 = vld [vmem:[#allocation5 + $0x78] sm:$0xff]  ;;  %s1940_s2 = smov [#allocation11]   ;;  %s1670_s21 = sshll.u32 %s2832_s5, 4  ;;  %s1671_s21 = int_to_ptr.hbm [resolvable:$true] %s1670_s21 }
  0x18   :  { %v1999_v2 = vld [vmem:[#allocation5 + $0x60] sm:$0xff]  ;;  %v138_v3 = vpack.c.bf16 %v1997_v1, %v1995_v0  ;;  %v2003_v4 = vld [vmem:[#allocation5 + $0x68] sm:$0xff]  ;;  %v2007_v6 = vld [vmem:[#allocation5 + $0x50] sm:$0xff]  ;;  %s1668_s4 = sshll.u32 %s1940_s2, 4  ;;  %s1669_s4 = int_to_ptr.vmem [resolvable:$true] %s1668_s4 }
  0x19   :  { %v137_v5 = vpack.c.bf16 %v2003_v4, %v1999_v2  ;;  %v2009_v7 = vld [vmem:[#allocation5 + $0x58] sm:$0xff]  ;;  %v2013_v9 = vld [vmem:[#allocation5 + $0x40] sm:$0xff]  ;;  %v2015_v10 = vld [vmem:[#allocation5 + $0x48] sm:$0xff] }
  0x1a   :  { %187 = vmatpush.bf16.msra.mxu0 %v138_v3  ;;  %1725 = vmatpush.bf16.msra.mxu1 %v138_v3  ;;  %v136_v8 = vpack.c.bf16 %v2009_v7, %v2007_v6  ;;  %v135_v11 = vpack.c.bf16 %v2015_v10, %v2013_v9  ;;  %v2019_v12 = vld [vmem:[#allocation5 + $0x30] sm:$0xff]  ;;  %v2021_v13 = vld [vmem:[#allocation5 + $0x38] sm:$0xff]  ;;  %v2025_v15 = vld [vmem:[#allocation5 + $0x20] sm:$0xff] }
  0x1b   :  { %1726 = vmatpush.bf16.msra.mxu2 %v138_v3  ;;  %1727 = vmatpush.bf16.msra.mxu3 %v138_v3  ;;  %v134_v14 = vpack.c.bf16 %v2021_v13, %v2019_v12  ;;  %v2027_v16 = vld [vmem:[#allocation5 + $0x28] sm:$0xff]  ;;  %v2031_v18 = vld [vmem:[#allocation5 + $0x10] sm:$0xff]  ;;  %v2033_v19 = vld [vmem:[#allocation5 + $0x18] sm:$0xff] }
  0x1c   :  { %v133_v17 = vpack.c.bf16 %v2027_v16, %v2025_v15  ;;  %v132_v20 = vpack.c.bf16 %v2033_v19, %v2031_v18  ;;  %v115_v21 = vld [vmem:[#allocation5] sm:$0xff]  ;;  %v2037_v22 = vld [vmem:[#allocation5 + $0x8] sm:$0xff]  ;;  %v2042_v25 = vld [vmem:[#allocation2 + $0x10] sm:$0xff] }
  0x1d   :  { %v131_v23 = vpack.c.bf16 %v2037_v22, %v115_v21  ;;  %v2040_v24 = vld [vmem:[#allocation2] sm:$0xff]  ;;  %v267_v26 = vld [vmem:[#allocation7 + $0x78] sm:$0xff]  ;;  %v2046_v28 = vld [vmem:[#allocation2 + $0x30] sm:$0xff] }
  0x1e   :  { %188 = vmatpush.bf16.msra.mxu0 %v137_v5  ;;  %1728 = vmatpush.bf16.msra.mxu1 %v137_v5  ;;  %v2044_v27 = vld [vmem:[#allocation2 + $0x20] sm:$0xff]  ;;  %v266_v29 = vld [vmem:[#allocation7 + $0x70] sm:$0xff]  ;;  %v265_v30 = vld [vmem:[#allocation7 + $0x68] sm:$0xff] }
  0x1f   :  { %1729 = vmatpush.bf16.msra.mxu2 %v137_v5  ;;  %1730 = vmatpush.bf16.msra.mxu3 %v137_v5  ;;  %v264_v31 = vld [vmem:[#allocation7 + $0x60] sm:$0xff]  ;;  %v263_v32 = vld [vmem:[#allocation7 + $0x58] sm:$0xff]  ;;  %v262_v33 = vld [vmem:[#allocation7 + $0x50] sm:$0xff] }
  0x20   :  { %v261_v34 = vld [vmem:[#allocation7 + $0x48] sm:$0xff]  ;;  %v260_v35 = vld [vmem:[#allocation7 + $0x40] sm:$0xff]  ;;  %v2054_v37 = vld [vmem:[#allocation2 + $0x18] sm:$0xff] }
  0x21   :  { %v2052_v36 = vld [vmem:[#allocation2 + $0x8] sm:$0xff]  ;;  %v2058_v39 = vld [vmem:[#allocation2 + $0x38] sm:$0xff]  ;;  %v258_v41 = vld [vmem:[#allocation7 + $0x30] sm:$0xff] }
  0x22   :  { %189 = vmatpush.bf16.msra.mxu0 %v136_v8  ;;  %1731 = vmatpush.bf16.msra.mxu1 %v136_v8  ;;  %v2056_v38 = vld [vmem:[#allocation2 + $0x28] sm:$0xff]  ;;  %v259_v40 = vld [vmem:[#allocation7 + $0x38] sm:$0xff]  ;;  %v256_v43 = vld [vmem:[#allocation7 + $0x20] sm:$0xff] }
  0x23   :  { %1732 = vmatpush.bf16.msra.mxu2 %v136_v8  ;;  %1733 = vmatpush.bf16.msra.mxu3 %v136_v8  ;;  %v257_v42 = vld [vmem:[#allocation7 + $0x28] sm:$0xff]  ;;  %v255_v44 = vld [vmem:[#allocation7 + $0x18] sm:$0xff]  ;;  %v254_v45 = vld [vmem:[#allocation7 + $0x10] sm:$0xff] }
  0x24   :  { %v253_v46 = vld [vmem:[#allocation7 + $0x8] sm:$0xff]  ;;  %v252_v47 = vld [vmem:[#allocation7] sm:$0xff] }
  0x26   :  { %190 = vmatpush.bf16.msra.mxu0 %v135_v11  ;;  %1734 = vmatpush.bf16.msra.mxu1 %v135_v11 }
  0x27   :  { %1735 = vmatpush.bf16.msra.mxu2 %v135_v11  ;;  %1736 = vmatpush.bf16.msra.mxu3 %v135_v11 }
  0x2a   :  { %191 = vmatpush.bf16.msra.mxu0 %v134_v14  ;;  %1737 = vmatpush.bf16.msra.mxu1 %v134_v14 }
  0x2b   :  { %1738 = vmatpush.bf16.msra.mxu2 %v134_v14  ;;  %1739 = vmatpush.bf16.msra.mxu3 %v134_v14 }
  0x2e   :  { %192 = vmatpush.bf16.msra.mxu0 %v133_v17  ;;  %1740 = vmatpush.bf16.msra.mxu1 %v133_v17 }
  0x2f   :  { %1741 = vmatpush.bf16.msra.mxu2 %v133_v17  ;;  %1742 = vmatpush.bf16.msra.mxu3 %v133_v17 }
  0x32   :  { %193 = vmatpush.bf16.msra.mxu0 %v132_v20  ;;  %1743 = vmatpush.bf16.msra.mxu1 %v132_v20 }
  0x33   :  { %1744 = vmatpush.bf16.msra.mxu2 %v132_v20  ;;  %1745 = vmatpush.bf16.msra.mxu3 %v132_v20 }
  0x36   :  { %194 = vmatpush.bf16.msra.mxu0 %v131_v23  ;;  %1746 = vmatpush.bf16.msra.mxu1 %v131_v23 }
  0x37   :  { %1747 = vmatpush.bf16.msra.mxu2 %v131_v23  ;;  %1748 = vmatpush.bf16.msra.mxu3 %v131_v23 }
  0x39   :  { %195 = vmatmul.bf16.vlgmr.msra.gmra.mxu0 %v2040_v24  ;;  %205 = vmatmul.bf16.vlgmr.msra.gmra.mxu1 %v2042_v25 }
  0x3a   :  { %268 = vmatpush.msrb.mxu1 %v267_v26  ;;  %215 = vmatmul.bf16.vlgmr.msra.gmra.mxu2 %v2044_v27 }
  0x3b   :  { %225 = vmatmul.bf16.vlgmr.msra.gmra.mxu3 %v2046_v28 }
  0x3c   :  { %269 = vmatpush.msrb.mxu1 %v266_v29 }
  0x3e   :  { %270 = vmatpush.msrb.mxu1 %v265_v30 }
  0x40   :  { %271 = vmatpush.msrb.mxu1 %v264_v31 }
  0x42   :  { %272 = vmatpush.msrb.mxu1 %v263_v32 }
  0x44   :  { %273 = vmatpush.msrb.mxu1 %v262_v33 }
  0x46   :  { %274 = vmatpush.msrb.mxu1 %v261_v34 }
  0x48   :  { %275 = vmatpush.msrb.mxu1 %v260_v35 }
  0x49   :  { %200 = vmatmul.bf16.gmra.mxu0 %v2052_v36  ;;  %210 = vmatmul.bf16.gmra.mxu1 %v2054_v37 }
  0x4a   :  { %220 = vmatmul.bf16.gmra.mxu2 %v2056_v38  ;;  %276 = vmatpush.msrb.mxu1 %v259_v40 }
  0x4b   :  { %230 = vmatmul.bf16.gmra.mxu3 %v2058_v39 }
  0x4c   :  { %277 = vmatpush.msrb.mxu1 %v258_v41 }
  0x4e   :  { %278 = vmatpush.msrb.mxu1 %v257_v42 }
  0x50   :  { %279 = vmatpush.msrb.mxu1 %v256_v43 }
  0x52   :  { %280 = vmatpush.msrb.mxu1 %v255_v44 }
  0x54   :  { %281 = vmatpush.msrb.mxu1 %v254_v45 }
  0x56   :  { %282 = vmatpush.msrb.mxu1 %v253_v46 }
  0x58   :  { %283 = vmatpush.msrb.mxu1 %v252_v47 }
  0xb6   :  { %v196_v48 = vpop.f32.mrf.mxu0  ;;  %v206_v55 = vpop.f32.mrf.mxu1 }
  0xb7   :  { %v236_v49 = vadd.f32 %v196_v48, %v115_v21  ;;  %v240_v57 = vadd.f32 %v206_v55, %v2025_v15 }
  0xb9   :  { %284 = vmatmul.f32.vlgmr.msrb.gmra.mxu1 %v236_v49 }
  0xbd   :  { %v216_v63 = vpop.f32.mrf.mxu2 }
  0xbe   :  { %v198_v50 = vpop.f32.mrf.mxu0  ;;  %v208_v58 = vpop.f32.mrf.mxu1  ;;  %v244_v5 = vadd.f32 %v216_v63, %v2013_v9 }
  0xbf   :  { %v237_v51 = vadd.f32 %v198_v50, %v2037_v22  ;;  %v241_v59 = vadd.f32 %v208_v58, %v2027_v16  ;;  %v226_v17 = vpop.f32.mrf.mxu3 }
  0xc1   :  { %287 = vmatmul.f32.gmra.mxu1 %v237_v51 }
  0xc5   :  { %v218_v8 = vpop.f32.mrf.mxu2 }
  0xc6   :  { %v201_v52 = vpop.f32.mrf.mxu0  ;;  %v211_v60 = vpop.f32.mrf.mxu1  ;;  %v245_v11 = vadd.f32 %v218_v8, %v2015_v10 }
  0xc7   :  { %v238_v53 = vadd.f32 %v201_v52, %v2031_v18  ;;  %v242_v61 = vadd.f32 %v211_v60, %v2019_v12  ;;  %v248_v18 = vadd.f32 %v226_v17, %v1999_v2 }
  0xc9   :  { %290 = vmatmul.f32.gmra.mxu1 %v238_v53 }
  0xcd   :  { %v221_v14 = vpop.f32.mrf.mxu2 }
  0xce   :  { %v203_v54 = vpop.f32.mrf.mxu0  ;;  %v213_v62 = vpop.f32.mrf.mxu1  ;;  %v246_v15 = vadd.f32 %v221_v14, %v2007_v6 }
  0xcf   :  { %v239_v56 = vadd.f32 %v203_v54, %v2033_v19  ;;  %v243_v3 = vadd.f32 %v213_v62, %v2021_v13  ;;  %v228_v13 = vpop.f32.mrf.mxu3 }
  0xd0   :  { %v249_v9 = vadd.f32 %v228_v13, %v2003_v4  ;;  %v476_v13 = vld [vmem:[#allocation8 + $0x70] sm:$0xff] }
  0xd1   :  { %293 = vmatmul.f32.gmra.mxu1 %v239_v56 }
  0xd5   :  { %v223_v16 = vpop.f32.mrf.mxu2 }
  0xd6   :  { %v247_v12 = vadd.f32 %v223_v16, %v2009_v7 }
  0xd7   :  { %v231_v19 = vpop.f32.mrf.mxu3 }
  0xd8   :  { %v250_v10 = vadd.f32 %v231_v19, %v1995_v0 }
  0xd9   :  { %296 = vmatmul.f32.gmra.mxu1 %v240_v57 }
  0xdf   :  { %v233_v20 = vpop.f32.mrf.mxu3 }
  0xe0   :  { %v251_v6 = vadd.f32 %v233_v20, %v1997_v1  ;;  %v475_v20 = vld [vmem:[#allocation8 + $0x68] sm:$0xff] }
  0xe1   :  { %299 = vmatmul.f32.gmra.mxu1 %v241_v59 }
  0xe9   :  { %302 = vmatmul.f32.gmra.mxu1 %v242_v61 }
  0xf1   :  { %305 = vmatmul.f32.gmra.mxu1 %v243_v3 }
  0xf9   :  { %308 = vmatmul.f32.gmra.mxu1 %v244_v5 }
 0x101   :  { %311 = vmatmul.f32.gmra.mxu1 %v245_v11 }
 0x109   :  { %314 = vmatmul.f32.gmra.mxu1 %v246_v15  ;;  %v477_v15 = vld [vmem:[#allocation8 + $0x78] sm:$0xff] }
 0x10a   :  { %478 = vmatpush.msrb.mxu2 %v477_v15  ;;  %v465_v15 = vld [vmem:[#allocation8 + $0x18] sm:$0xff] }
 0x10c   :  { %479 = vmatpush.msrb.mxu2 %v476_v13  ;;  %v463_v13 = vld [vmem:[#allocation8 + $0x8] sm:$0xff] }
 0x10e   :  { %480 = vmatpush.msrb.mxu2 %v475_v20 }
 0x111   :  { %317 = vmatmul.f32.gmra.mxu1 %v247_v12 }
 0x119   :  { %320 = vmatmul.f32.gmra.mxu1 %v248_v18 }
 0x121   :  { %323 = vmatmul.f32.gmra.mxu1 %v249_v9 }
 0x129   :  { %326 = vmatmul.f32.gmra.mxu1 %v250_v10 }
 0x131   :  { %329 = vmatmul.f32.gmra.mxu1 %v251_v6 }
 0x136   :  { %v2079_v21 = vpop.f32.mrf.mxu1 }
 0x137   :  { %v354_v33 = vmul.f32 %v2079_v21, %v2079_v21 }
 0x13e   :  { %v2081_v22 = vpop.f32.mrf.mxu1 }
 0x13f   :  { %v355_v32 = vmul.f32 %v2081_v22, %v2081_v22  ;;  %v333_v34 = vadd.f32 %v2081_v22, %v2079_v21 }
 0x141   :  { %v370_v40 = vadd.f32 %v355_v32, %v354_v33 }
 0x146   :  { %v2083_v7 = vpop.f32.mrf.mxu1 }
 0x147   :  { %v356_v35 = vmul.f32 %v2083_v7, %v2083_v7  ;;  %v334_v41 = vadd.f32 %v333_v34, %v2083_v7  ;;  %v474_v34 = vld [vmem:[#allocation8 + $0x60] sm:$0xff] }
 0x148   :  { %481 = vmatpush.msrb.mxu2 %v474_v34 }
 0x149   :  { %v371_v44 = vadd.f32 %v370_v40, %v356_v35 }
 0x14e   :  { %v2085_v2 = vpop.f32.mrf.mxu1 }
 0x14f   :  { %v357_v42 = vmul.f32 %v2085_v2, %v2085_v2  ;;  %v335_v45 = vadd.f32 %v334_v41, %v2085_v2  ;;  %v473_v41 = vld [vmem:[#allocation8 + $0x58] sm:$0xff] }
 0x150   :  { %482 = vmatpush.msrb.mxu2 %v473_v41  ;;  %v407_v41 = vld [vmem:[#allocation10] sm:$0x1] }
 0x151   :  { %v372_v47 = vadd.f32 %v371_v44, %v357_v42 }
 0x156   :  { %v2087_v23 = vpop.f32.mrf.mxu1 }
 0x157   :  { %v358_v46 = vmul.f32 %v2087_v23, %v2087_v23  ;;  %v336_v48 = vadd.f32 %v335_v45, %v2087_v23 }
 0x159   :  { %v373_v50 = vadd.f32 %v372_v47, %v358_v46  ;;  %v472_v47 = vld [vmem:[#allocation8 + $0x50] sm:$0xff] }
 0x15a   :  { %483 = vmatpush.msrb.mxu2 %v472_v47 }
 0x15e   :  { %v2089_v4 = vpop.f32.mrf.mxu1 }
 0x15f   :  { %v359_v49 = vmul.f32 %v2089_v4, %v2089_v4  ;;  %v337_v51 = vadd.f32 %v336_v48, %v2089_v4 }
 0x161   :  { %v374_v53 = vadd.f32 %v373_v50, %v359_v49  ;;  %v471_v50 = vld [vmem:[#allocation8 + $0x48] sm:$0xff] }
 0x162   :  { %484 = vmatpush.msrb.mxu2 %v471_v50 }
 0x166   :  { %v2091_v26 = vpop.f32.mrf.mxu1 }
 0x167   :  { %v360_v52 = vmul.f32 %v2091_v26, %v2091_v26  ;;  %v338_v54 = vadd.f32 %v337_v51, %v2091_v26 }
 0x169   :  { %v375_v57 = vadd.f32 %v374_v53, %v360_v52  ;;  %v470_v53 = vld [vmem:[#allocation8 + $0x40] sm:$0xff] }
 0x16a   :  { %485 = vmatpush.msrb.mxu2 %v470_v53 }
 0x16e   :  { %v2093_v0 = vpop.f32.mrf.mxu1 }
 0x16f   :  { %v361_v55 = vmul.f32 %v2093_v0, %v2093_v0  ;;  %v339_v58 = vadd.f32 %v338_v54, %v2093_v0 }
 0x171   :  { %v376_v61 = vadd.f32 %v375_v57, %v361_v55  ;;  %v469_v57 = vld [vmem:[#allocation8 + $0x38] sm:$0xff] }
 0x172   :  { %486 = vmatpush.msrb.mxu2 %v469_v57 }
 0x176   :  { %v2095_v29 = vpop.f32.mrf.mxu1 }
 0x177   :  { %v362_v59 = vmul.f32 %v2095_v29, %v2095_v29  ;;  %v340_v60 = vadd.f32 %v339_v58, %v2095_v29 }
 0x179   :  { %v377_v63 = vadd.f32 %v376_v61, %v362_v59 }
 0x17e   :  { %v2097_v1 = vpop.f32.mrf.mxu1 }
 0x17f   :  { %v363_v62 = vmul.f32 %v2097_v1, %v2097_v1  ;;  %v341_v3 = vadd.f32 %v340_v60, %v2097_v1  ;;  %v468_v60 = vld [vmem:[#allocation8 + $0x30] sm:$0xff] }
 0x180   :  { %487 = vmatpush.msrb.mxu2 %v468_v60 }
 0x181   :  { %v378_v8 = vadd.f32 %v377_v63, %v363_v62  ;;  %v467_v63 = vld [vmem:[#allocation8 + $0x28] sm:$0xff] }
 0x182   :  { %488 = vmatpush.msrb.mxu2 %v467_v63 }
 0x186   :  { %v2099_v30 = vpop.f32.mrf.mxu1 }
 0x187   :  { %v364_v5 = vmul.f32 %v2099_v30, %v2099_v30  ;;  %v342_v11 = vadd.f32 %v341_v3, %v2099_v30 }
 0x189   :  { %v379_v17 = vadd.f32 %v378_v8, %v364_v5  ;;  %v466_v8 = vld [vmem:[#allocation8 + $0x20] sm:$0xff] }
 0x18a   :  { %489 = vmatpush.msrb.mxu2 %v466_v8 }
 0x18c   :  { %490 = vmatpush.msrb.mxu2 %v465_v15 }
 0x18e   :  { %v2101_v31 = vpop.f32.mrf.mxu1 }
 0x18f   :  { %v365_v14 = vmul.f32 %v2101_v31, %v2101_v31  ;;  %v343_v12 = vadd.f32 %v342_v11, %v2101_v31 }
 0x191   :  { %v380_v9 = vadd.f32 %v379_v17, %v365_v14 }
 0x196   :  { %v2114_v43 = vpop.f32.mrf.mxu1 }
 0x197   :  { %v366_v18 = vmul.f32 %v2114_v43, %v2114_v43  ;;  %v344_v19 = vadd.f32 %v343_v12, %v2114_v43 }
 0x199   :  { %v381_v6 = vadd.f32 %v380_v9, %v366_v18  ;;  %v464_v18 = vld [vmem:[#allocation8 + $0x10] sm:$0xff] }
 0x19a   :  { %491 = vmatpush.msrb.mxu2 %v464_v18 }
 0x19c   :  { %492 = vmatpush.msrb.mxu2 %v463_v13 }
 0x19e   :  { %v2128_v56 = vpop.f32.mrf.mxu1 }
 0x19f   :  { %v367_v10 = vmul.f32 %v2128_v56, %v2128_v56  ;;  %v345_v32 = vadd.f32 %v344_v19, %v2128_v56  ;;  %v462_v19 = vld [vmem:[#allocation8] sm:$0xff] }
 0x1a0   :  { %493 = vmatpush.msrb.mxu2 %v462_v19 }
 0x1a1   :  { %v382_v35 = vadd.f32 %v381_v6, %v367_v10 }
 0x1a6   :  { %v2142_v16 = vpop.f32.mrf.mxu1 }
 0x1a7   :  { %v368_v33 = vmul.f32 %v2142_v16, %v2142_v16  ;;  %v346_v40 = vadd.f32 %v345_v32, %v2142_v16 }
 0x1a9   :  { %v383_v44 = vadd.f32 %v382_v35, %v368_v33 }
 0x1ae   :  { %v2154_v42 = vpop.f32.mrf.mxu1 }
 0x1af   :  { %v347_v45 = vadd.f32 %v346_v40, %v2154_v42  ;;  %v369_v46 = vmul.f32 %v2154_v42, %v2154_v42 }
 0x1b1   :  { %v348_v48 = vrot.slane %v347_v45, 4  ;;  %v384_v49 = vadd.f32 %v383_v44, %v369_v46  ;;  %v409_v46 = vld [vmem:[#allocation10 + $0x1] sm:$0x1] }
 0x1b3   :  { %v349_v51 = vadd.f32 %v348_v48, %v347_v45  ;;  %v385_v52 = vrot.slane %v384_v49, 4 }
 0x1b5   :  { %v350_v54 = vrot.slane %v349_v51, 2  ;;  %v386_v55 = vadd.f32 %v385_v52, %v384_v49 }
 0x1b7   :  { %v351_v58 = vadd.f32 %v350_v54, %v349_v51  ;;  %v387_v59 = vrot.slane %v386_v55, 2 }
 0x1b9   :  { %v352_v61 = vrot.slane %v351_v58, 1  ;;  %v388_v62 = vadd.f32 %v387_v59, %v386_v55 }
 0x1bb   :  { %v353_v3 = vadd.f32 %v352_v61, %v351_v58  ;;  %v389_v5 = vrot.slane %v388_v62, 1 }
 0x1bd   :  { %v390_v11 = vadd.f32 %v389_v5, %v388_v62  ;;  %v391_v14 = vmul.f32 0.0078125, %v353_v3 }
 0x1bf   :  { %v392_v17 = vmul.f32 0.0078125, %v390_v11  ;;  %v393_v12 = vmul.f32 %v391_v14, %v391_v14 }
 0x1c1   :  { %v394_v9 = vsub.f32 %v392_v17, %v393_v12 }
 0x1c3   :  { %v395_v10 = vmax.f32 %v394_v9, 0.0 }
 0x1c5   :  { %v396_v20 = vadd.f32 1e-05, %v395_v10 }
 0x1c7   :  { %1759 = vrsqrt.f32 %v396_v20  ;;  %vm403_vm1 = vweird.f32 %v396_v20 }
 0x1cd   :  { %v1760_v6 = vpop.eup %1759 }
 0x1ce   :  { %v398_v32 = vmul.f32 %v1760_v6, %v396_v20  ;;  %vm404_vm0 = vweird.f32 %v1760_v6 }
 0x1cf   :  { %vm405_vm2 = vmor %vm403_vm1, %vm404_vm0 }
 0x1d0   :  { %v399_v33 = vmul.f32 %v1760_v6, %v398_v32 }
 0x1d2   :  { %v400_v34 = vmul.f32 0.5, %v399_v33 }
 0x1d4   :  { %v401_v35 = vsub.f32 1.5, %v400_v34 }
 0x1d6   :  { %v402_v40 = vmul.f32 %v1760_v6, %v401_v35 }
 0x1d8   :  { %v406_v44 = vsel %vm405_vm2, %v1760_v6, %v402_v40 }
 0x1d9   :  { %v408_v45 = vmul.f32 %v407_v41, %v406_v44 }
 0x1db   :  { %v410_v47 = vmul.f32 %v408_v45, %v391_v14  ;;  %v412_v48 = vperm.slane %v408_v45, 0 }
 0x1dd   :  { %v411_v49 = vsub.f32 %v409_v46, %v410_v47  ;;  %v413_v51 = vmul.f32 %v412_v48, %v2079_v21  ;;  %v421_v53 = vmul.f32 %v412_v48, %v2095_v29  ;;  %v422_v55 = vmul.f32 %v412_v48, %v2097_v1 }
 0x1de   :  { %v423_v57 = vmul.f32 %v412_v48, %v2099_v30  ;;  %v424_v58 = vmul.f32 %v412_v48, %v2101_v31  ;;  %v428_v59 = vmul.f32 %v412_v48, %v2154_v42  ;;  %v414_v60 = vmul.f32 %v412_v48, %v2081_v22 }
 0x1df   :  { %v429_v50 = vperm.slane %v411_v49, 0  ;;  %v425_v61 = vmul.f32 %v412_v48, %v2114_v43  ;;  %v426_v29 = vmul.f32 %v412_v48, %v2128_v56  ;;  %v427_v1 = vmul.f32 %v412_v48, %v2142_v16 }
 0x1e0   :  { %v415_v22 = vmul.f32 %v412_v48, %v2083_v7  ;;  %v416_v15 = vmul.f32 %v412_v48, %v2085_v2  ;;  %v417_v56 = vmul.f32 %v412_v48, %v2087_v23  ;;  %v418_v13 = vmul.f32 %v412_v48, %v2089_v4 }
 0x1e1   :  { %v430_v52 = vadd.f32 %v429_v50, %v413_v51  ;;  %v438_v62 = vadd.f32 %v429_v50, %v421_v53  ;;  %v439_v63 = vadd.f32 %v429_v50, %v422_v55  ;;  %v440_v21 = vadd.f32 %v429_v50, %v423_v57 }
 0x1e2   :  { %v441_v3 = vadd.f32 %v429_v50, %v424_v58  ;;  %v442_v5 = vadd.f32 %v429_v50, %v425_v61  ;;  %v445_v8 = vadd.f32 %v429_v50, %v428_v59  ;;  %v431_v30 = vadd.f32 %v429_v50, %v414_v60 }
 0x1e3   :  { %v446_v54 = vmax.f32 %v430_v52, 0.0  ;;  %v443_v11 = vadd.f32 %v429_v50, %v426_v29  ;;  %v444_v31 = vadd.f32 %v429_v50, %v427_v1  ;;  %v432_v42 = vadd.f32 %v429_v50, %v415_v22 }
 0x1e4   :  { %v447_v14 = vmax.f32 %v431_v30, 0.0  ;;  %v433_v17 = vadd.f32 %v429_v50, %v416_v15  ;;  %v434_v18 = vadd.f32 %v429_v50, %v417_v56  ;;  %v435_v9 = vadd.f32 %v429_v50, %v418_v13 }
 0x1e5   :  { %494 = vmatmul.f32.vlgmr.msrb.gmra.mxu2 %v446_v54  ;;  %v448_v43 = vmax.f32 %v432_v42, 0.0  ;;  %v419_v7 = vmul.f32 %v412_v48, %v2091_v26  ;;  %v420_v2 = vmul.f32 %v412_v48, %v2093_v0  ;;  %v454_v33 = vmax.f32 %v438_v62, 0.0 }
 0x1e6   :  { %v449_v12 = vmax.f32 %v433_v17, 0.0  ;;  %v450_v16 = vmax.f32 %v434_v18, 0.0  ;;  %v451_v19 = vmax.f32 %v435_v9, 0.0  ;;  %v455_v23 = vmax.f32 %v439_v63, 0.0 }
 0x1e7   :  { %v436_v10 = vadd.f32 %v429_v50, %v419_v7  ;;  %v437_v6 = vadd.f32 %v429_v50, %v420_v2  ;;  %v456_v34 = vmax.f32 %v440_v21, 0.0  ;;  %v457_v4 = vmax.f32 %v441_v3, 0.0 }
 0x1e8   :  { %v458_v35 = vmax.f32 %v442_v5, 0.0  ;;  %v459_v40 = vmax.f32 %v443_v11, 0.0  ;;  %v460_v26 = vmax.f32 %v444_v31, 0.0  ;;  %v461_v41 = vmax.f32 %v445_v8, 0.0 }
 0x1e9   :  { %v452_v20 = vmax.f32 %v436_v10, 0.0  ;;  %v453_v32 = vmax.f32 %v437_v6, 0.0 }
 0x1ed   :  { %497 = vmatmul.f32.gmra.mxu2 %v447_v14 }
 0x1f5   :  { %500 = vmatmul.f32.gmra.mxu2 %v448_v43 }
 0x1fd   :  { %503 = vmatmul.f32.gmra.mxu2 %v449_v12 }
 0x205   :  { %506 = vmatmul.f32.gmra.mxu2 %v450_v16 }
 0x20d   :  { %509 = vmatmul.f32.gmra.mxu2 %v451_v19 }
 0x215   :  { %512 = vmatmul.f32.gmra.mxu2 %v452_v20 }
 0x21d   :  { %515 = vmatmul.f32.gmra.mxu2 %v453_v32 }
 0x225   :  { %518 = vmatmul.f32.gmra.mxu2 %v454_v33 }
 0x22d   :  { %521 = vmatmul.f32.gmra.mxu2 %v455_v23 }
 0x235   :  { %524 = vmatmul.f32.gmra.mxu2 %v456_v34 }
 0x23d   :  { %527 = vmatmul.f32.gmra.mxu2 %v457_v4 }
 0x245   :  { %530 = vmatmul.f32.gmra.mxu2 %v458_v35 }
 0x24d   :  { %533 = vmatmul.f32.gmra.mxu2 %v459_v40 }
 0x255   :  { %536 = vmatmul.f32.gmra.mxu2 %v460_v26 }
 0x25d   :  { %539 = vmatmul.f32.gmra.mxu2 %v461_v41 }
 0x268   :  { %v2175_v0 = vpop.f32.mrf.mxu2 }
 0x269   :  { %v564_v57 = vmul.f32 %v2175_v0, %v2175_v0 }
 0x270   :  { %v2177_v44 = vpop.f32.mrf.mxu2 }
 0x271   :  { %v565_v55 = vmul.f32 %v2177_v44, %v2177_v44  ;;  %v543_v58 = vadd.f32 %v2177_v44, %v2175_v0 }
 0x273   :  { %v580_v61 = vadd.f32 %v565_v55, %v564_v57 }
 0x278   :  { %v2179_v45 = vpop.f32.mrf.mxu2 }
 0x279   :  { %v566_v59 = vmul.f32 %v2179_v45, %v2179_v45  ;;  %v544_v60 = vadd.f32 %v543_v58, %v2179_v45 }
 0x27b   :  { %v581_v21 = vadd.f32 %v580_v61, %v566_v59 }
 0x280   :  { %v2181_v46 = vpop.f32.mrf.mxu2 }
 0x281   :  { %v567_v62 = vmul.f32 %v2181_v46, %v2181_v46  ;;  %v545_v3 = vadd.f32 %v544_v60, %v2181_v46 }
 0x283   :  { %v582_v1 = vadd.f32 %v581_v21, %v567_v62 }
 0x288   :  { %v2183_v47 = vpop.f32.mrf.mxu2 }
 0x289   :  { %v568_v5 = vmul.f32 %v2183_v47, %v2183_v47  ;;  %v546_v29 = vadd.f32 %v545_v3, %v2183_v47 }
 0x28b   :  { %v583_v30 = vadd.f32 %v582_v1, %v568_v5 }
 0x290   :  { %v2185_v48 = vpop.f32.mrf.mxu2 }
 0x291   :  { %v569_v8 = vmul.f32 %v2185_v48, %v2185_v48  ;;  %v547_v11 = vadd.f32 %v546_v29, %v2185_v48 }
 0x293   :  { %v584_v22 = vadd.f32 %v583_v30, %v569_v8 }
 0x298   :  { %v2187_v49 = vpop.f32.mrf.mxu2 }
 0x299   :  { %v570_v31 = vmul.f32 %v2187_v49, %v2187_v49  ;;  %v548_v14 = vadd.f32 %v547_v11, %v2187_v49 }
 0x29b   :  { %v585_v15 = vadd.f32 %v584_v22, %v570_v31 }
 0x2a0   :  { %v2189_v50 = vpop.f32.mrf.mxu2 }
 0x2a1   :  { %v571_v42 = vmul.f32 %v2189_v50, %v2189_v50  ;;  %v549_v17 = vadd.f32 %v548_v14, %v2189_v50 }
 0x2a3   :  { %v586_v18 = vadd.f32 %v585_v15, %v571_v42 }
 0x2a8   :  { %v2191_v51 = vpop.f32.mrf.mxu2 }
 0x2a9   :  { %v572_v12 = vmul.f32 %v2191_v51, %v2191_v51  ;;  %v550_v56 = vadd.f32 %v549_v17, %v2191_v51 }
 0x2ab   :  { %v587_v13 = vadd.f32 %v586_v18, %v572_v12 }
 0x2b0   :  { %v2193_v52 = vpop.f32.mrf.mxu2 }
 0x2b1   :  { %v573_v16 = vmul.f32 %v2193_v52, %v2193_v52  ;;  %v551_v9 = vadd.f32 %v550_v56, %v2193_v52 }
 0x2b3   :  { %v588_v7 = vadd.f32 %v587_v13, %v573_v16 }
 0x2b8   :  { %v2195_v53 = vpop.f32.mrf.mxu2 }
 0x2b9   :  { %v574_v19 = vmul.f32 %v2195_v53, %v2195_v53  ;;  %v552_v10 = vadd.f32 %v551_v9, %v2195_v53 }
 0x2bb   :  { %v589_v6 = vadd.f32 %v588_v7, %v574_v19 }
 0x2c0   :  { %v2197_v54 = vpop.f32.mrf.mxu2 }
 0x2c1   :  { %v575_v20 = vmul.f32 %v2197_v54, %v2197_v54  ;;  %v553_v32 = vadd.f32 %v552_v10, %v2197_v54 }
 0x2c3   :  { %v590_v23 = vadd.f32 %v589_v6, %v575_v20  ;;  %v617_v20 = vld [vmem:[#allocation10 + $0x2] sm:$0x1] }
 0x2c8   :  { %v2210_v63 = vpop.f32.mrf.mxu2 }
 0x2c9   :  { %v576_v33 = vmul.f32 %v2210_v63, %v2210_v63  ;;  %v554_v34 = vadd.f32 %v553_v32, %v2210_v63 }
 0x2cb   :  { %v591_v35 = vadd.f32 %v590_v23, %v576_v33  ;;  %v619_v33 = vld [vmem:[#allocation10 + $0x3] sm:$0x1] }
 0x2d0   :  { %v2224_v43 = vpop.f32.mrf.mxu2 }
 0x2d1   :  { %v577_v4 = vmul.f32 %v2224_v43, %v2224_v43  ;;  %v555_v40 = vadd.f32 %v554_v34, %v2224_v43 }
 0x2d3   :  { %v592_v41 = vadd.f32 %v591_v35, %v577_v4 }
 0x2d8   :  { %v537_v2 = vpop.f32.mrf.mxu2 }
 0x2d9   :  { %v578_v26 = vmul.f32 %v537_v2, %v537_v2  ;;  %v556_v55 = vadd.f32 %v555_v40, %v537_v2 }
 0x2db   :  { %v593_v58 = vadd.f32 %v592_v41, %v578_v26 }
 0x2e0   :  { %v540_v57 = vpop.f32.mrf.mxu2 }
 0x2e1   :  { %v557_v59 = vadd.f32 %v556_v55, %v540_v57  ;;  %v579_v60 = vmul.f32 %v540_v57, %v540_v57 }
 0x2e3   :  { %v558_v61 = vrot.slane %v557_v59, 4  ;;  %v594_v62 = vadd.f32 %v593_v58, %v579_v60 }
 0x2e5   :  { %v559_v21 = vadd.f32 %v558_v61, %v557_v59  ;;  %v595_v3 = vrot.slane %v594_v62, 4 }
 0x2e7   :  { %v560_v5 = vrot.slane %v559_v21, 2  ;;  %v596_v29 = vadd.f32 %v595_v3, %v594_v62 }
 0x2e9   :  { %v561_v1 = vadd.f32 %v560_v5, %v559_v21  ;;  %v597_v8 = vrot.slane %v596_v29, 2 }
 0x2eb   :  { %v562_v30 = vrot.slane %v561_v1, 1  ;;  %v598_v11 = vadd.f32 %v597_v8, %v596_v29 }
 0x2ed   :  { %v563_v31 = vadd.f32 %v562_v30, %v561_v1  ;;  %v599_v14 = vrot.slane %v598_v11, 1 }
 0x2ef   :  { %v600_v22 = vadd.f32 %v599_v14, %v598_v11  ;;  %v601_v42 = vmul.f32 0.0078125, %v563_v31 }
 0x2f1   :  { %v602_v15 = vmul.f32 0.0078125, %v600_v22  ;;  %v603_v17 = vmul.f32 %v601_v42, %v601_v42 }
 0x2f3   :  { %v604_v12 = vsub.f32 %v602_v15, %v603_v17 }
 0x2f5   :  { %v605_v56 = vmax.f32 %v604_v12, 0.0 }
 0x2f7   :  { %v606_v18 = vadd.f32 1e-05, %v605_v56 }
 0x2f9   :  { %1761 = vrsqrt.f32 %v606_v18  ;;  %vm613_vm4 = vweird.f32 %v606_v18 }
 0x2ff   :  { %v1762_v16 = vpop.eup %1761 }
 0x300   :  { %v608_v13 = vmul.f32 %v1762_v16, %v606_v18  ;;  %vm614_vm3 = vweird.f32 %v1762_v16 }
 0x301   :  { %vm615_vm5 = vmor %vm613_vm4, %vm614_vm3 }
 0x302   :  { %v609_v9 = vmul.f32 %v1762_v16, %v608_v13 }
 0x304   :  { %v610_v19 = vmul.f32 0.5, %v609_v9 }
 0x306   :  { %v611_v7 = vsub.f32 1.5, %v610_v19 }
 0x308   :  { %v612_v10 = vmul.f32 %v1762_v16, %v611_v7 }
 0x30a   :  { %v616_v6 = vsel %vm615_vm5, %v1762_v16, %v612_v10 }
 0x30b   :  { %v618_v32 = vmul.f32 %v617_v20, %v616_v6 }
 0x30d   :  { %v620_v23 = vmul.f32 %v618_v32, %v601_v42  ;;  %v622_v34 = vperm.slane %v618_v32, 0 }
 0x30f   :  { %v621_v4 = vsub.f32 %v619_v33, %v620_v23  ;;  %v638_v35 = vmul.f32 %v622_v34, %v540_v57  ;;  %v637_v26 = vmul.f32 %v622_v34, %v537_v2  ;;  %v635_v41 = vmul.f32 %v622_v34, %v2210_v63 }
 0x310   :  { %v636_v55 = vmul.f32 %v622_v34, %v2224_v43  ;;  %v633_v62 = vmul.f32 %v622_v34, %v2195_v53  ;;  %v634_v2 = vmul.f32 %v622_v34, %v2197_v54  ;;  %v631_v53 = vmul.f32 %v622_v34, %v2191_v51 }
 0x311   :  { %v639_v40 = vperm.slane %v621_v4, 0  ;;  %v632_v1 = vmul.f32 %v622_v34, %v2193_v52  ;;  %v629_v14 = vmul.f32 %v622_v34, %v2187_v49  ;;  %v630_v51 = vmul.f32 %v622_v34, %v2189_v50 }
 0x312   :  { %v627_v12 = vmul.f32 %v622_v34, %v2183_v47  ;;  %v628_v49 = vmul.f32 %v622_v34, %v2185_v48  ;;  %v625_v9 = vmul.f32 %v622_v34, %v2179_v45  ;;  %v626_v47 = vmul.f32 %v622_v34, %v2181_v46 }
 0x313   :  { %v2247_v58 = vadd.f32 %v639_v40, %v637_v26  ;;  %v2249_v59 = vadd.f32 %v639_v40, %v638_v35  ;;  %v2251_v60 = vadd.f32 %v639_v40, %v635_v41  ;;  %v2253_v61 = vadd.f32 %v639_v40, %v636_v55 }
 0x314   :  { %v2259_v3 = vadd.f32 %v639_v40, %v633_v62  ;;  %v2267_v29 = vadd.f32 %v639_v40, %v634_v2  ;;  %v2271_v8 = vadd.f32 %v639_v40, %v631_v53  ;;  %v2273_v54 = vadd.f32 %v639_v40, %v632_v1  ;;  %v757_v62 = vld [vmem:[#allocation7 + $0xd8] sm:$0xff]  ;;  %v751_v2 = vld [vmem:[#allocation7 + $0xa8] sm:$0xff]  ;;  %v748_v1 = vld [vmem:[#allocation7 + $0x90] sm:$0xff] }
 0x315   :  { %v670_v21 = vmax.f32 %v2247_v58, 0.0  ;;  %v671_v57 = vmax.f32 %v2249_v59, 0.0  ;;  %v668_v43 = vmax.f32 %v2251_v60, 0.0  ;;  %v669_v5 = vmax.f32 %v2253_v61, 0.0  ;;  %v749_v53 = vld [vmem:[#allocation7 + $0x98] sm:$0xff] }
 0x316   :  { %v666_v11 = vmax.f32 %v2259_v3, 0.0  ;;  %v667_v31 = vmax.f32 %v2267_v29, 0.0  ;;  %v664_v52 = vmax.f32 %v2271_v8, 0.0  ;;  %v665_v22 = vmax.f32 %v2273_v54, 0.0 }
 0x317   :  { %v679_v63 = vpack.c.bf16 %v671_v57, %v670_v21  ;;  %v678_v30 = vpack.c.bf16 %v669_v5, %v668_v43  ;;  %v2289_v15 = vadd.f32 %v639_v40, %v629_v14  ;;  %v2291_v17 = vadd.f32 %v639_v40, %v630_v51 }
 0x318   :  { %v677_v42 = vpack.c.bf16 %v667_v31, %v666_v11  ;;  %v676_v50 = vpack.c.bf16 %v665_v22, %v664_v52  ;;  %v2301_v16 = vadd.f32 %v639_v40, %v627_v12  ;;  %v2303_v13 = vadd.f32 %v639_v40, %v628_v49 }
 0x319   :  { %680 = vmatpush.bf16.msrb.mxu3 %v679_v63  ;;  %v662_v56 = vmax.f32 %v2289_v15, 0.0  ;;  %v663_v18 = vmax.f32 %v2291_v17, 0.0  ;;  %v2307_v19 = vadd.f32 %v639_v40, %v625_v9  ;;  %v2315_v20 = vadd.f32 %v639_v40, %v626_v47  ;;  %v750_v63 = vld [vmem:[#allocation7 + $0xa0] sm:$0xff] }
 0x31a   :  { %v660_v7 = vmax.f32 %v2301_v16, 0.0  ;;  %v661_v10 = vmax.f32 %v2303_v13, 0.0  ;;  %v623_v6 = vmul.f32 %v622_v34, %v2175_v0  ;;  %v624_v45 = vmul.f32 %v622_v34, %v2177_v44  ;;  %v761_v0 = vld [vmem:[#allocation7 + $0xf8] sm:$0xff]  ;;  %v760_v44 = vld [vmem:[#allocation7 + $0xf0] sm:$0xff]  ;;  %v759_v34 = vld [vmem:[#allocation7 + $0xe8] sm:$0xff] }
 0x31b   :  { %v675_v48 = vpack.c.bf16 %v663_v18, %v662_v56  ;;  %v658_v46 = vmax.f32 %v2307_v19, 0.0  ;;  %v659_v33 = vmax.f32 %v2315_v20, 0.0  ;;  %762 = vmatpush.msrb.mxu0 %v761_v0 }
 0x31c   :  { %v674_v32 = vpack.c.bf16 %v661_v10, %v660_v7  ;;  %v640_v23 = vadd.f32 %v639_v40, %v623_v6  ;;  %v641_v4 = vadd.f32 %v639_v40, %v624_v45  ;;  %v758_v40 = vld [vmem:[#allocation7 + $0xe0] sm:$0xff] }
 0x31d   :  { %681 = vmatpush.bf16.msrb.mxu3 %v678_v30  ;;  %v673_v35 = vpack.c.bf16 %v659_v33, %v658_v46  ;;  %763 = vmatpush.msrb.mxu0 %v760_v44  ;;  %v746_v30 = vld [vmem:[#allocation7 + $0x80] sm:$0xff] }
 0x31e   :  { %v656_v26 = vmax.f32 %v640_v23, 0.0  ;;  %v657_v41 = vmax.f32 %v641_v4, 0.0 }
 0x31f   :  { %764 = vmatpush.msrb.mxu0 %v759_v34 }
 0x320   :  { %v672_v55 = vpack.c.bf16 %v657_v41, %v656_v26 }
 0x321   :  { %682 = vmatpush.bf16.msrb.mxu3 %v677_v42  ;;  %765 = vmatpush.msrb.mxu0 %v758_v40 }
 0x323   :  { %766 = vmatpush.msrb.mxu0 %v757_v62 }
 0x325   :  { %683 = vmatpush.bf16.msrb.mxu3 %v676_v50 }
 0x329   :  { %684 = vmatpush.bf16.msrb.mxu3 %v675_v48 }
 0x32d   :  { %685 = vmatpush.bf16.msrb.mxu3 %v674_v32 }
 0x331   :  { %686 = vmatpush.bf16.msrb.mxu3 %v673_v35 }
 0x335   :  { %687 = vmatpush.bf16.msrb.mxu3 %v672_v55 }
 0x338   :  { %688 = vmatmul.bf16.vlgmr.msrb.gmra.mxu3 %v2040_v24  ;;  %v756_v24 = vld [vmem:[#allocation7 + $0xd0] sm:$0xff] }
 0x339   :  { %767 = vmatpush.msrb.mxu0 %v756_v24 }
 0x348   :  { %693 = vmatmul.bf16.gmra.mxu3 %v2052_v36  ;;  %v755_v36 = vld [vmem:[#allocation7 + $0xc8] sm:$0xff] }
 0x349   :  { %768 = vmatpush.msrb.mxu0 %v755_v36 }
 0x358   :  { %698 = vmatmul.bf16.gmra.mxu3 %v2042_v25  ;;  %v754_v25 = vld [vmem:[#allocation7 + $0xc0] sm:$0xff] }
 0x359   :  { %769 = vmatpush.msrb.mxu0 %v754_v25 }
 0x368   :  { %703 = vmatmul.bf16.gmra.mxu3 %v2054_v37  ;;  %v753_v37 = vld [vmem:[#allocation7 + $0xb8] sm:$0xff] }
 0x369   :  { %770 = vmatpush.msrb.mxu0 %v753_v37 }
 0x378   :  { %708 = vmatmul.bf16.gmra.mxu3 %v2044_v27  ;;  %v752_v27 = vld [vmem:[#allocation7 + $0xb0] sm:$0xff] }
 0x379   :  { %771 = vmatpush.msrb.mxu0 %v752_v27 }
 0x37b   :  { %772 = vmatpush.msrb.mxu0 %v751_v2 }
 0x37d   :  { %773 = vmatpush.msrb.mxu0 %v750_v63 }
 0x37f   :  { %774 = vmatpush.msrb.mxu0 %v749_v53 }
 0x381   :  { %775 = vmatpush.msrb.mxu0 %v748_v1 }
 0x388   :  { %713 = vmatmul.bf16.gmra.mxu3 %v2056_v38  ;;  %v747_v38 = vld [vmem:[#allocation7 + $0x88] sm:$0xff] }
 0x389   :  { %776 = vmatpush.msrb.mxu0 %v747_v38 }
 0x38b   :  { %777 = vmatpush.msrb.mxu0 %v746_v30 }
 0x398   :  { %718 = vmatmul.bf16.gmra.mxu3 %v2046_v28 }
 0x3a8   :  { %723 = vmatmul.bf16.gmra.mxu3 %v2058_v39 }
 0x3bb   :  { %v689_v14 = vpop.f32.mrf.mxu3 }
 0x3bc   :  { %v729_v51 = vadd.f32 %v689_v14, %v656_v26 }
 0x3be   :  { %778 = vmatmul.f32.vlgmr.msrb.gmra.mxu0 %v729_v51 }
 0x3c3   :  { %v691_v42 = vpop.f32.mrf.mxu3 }
 0x3c4   :  { %v730_v12 = vadd.f32 %v691_v42, %v657_v41 }
 0x3c6   :  { %781 = vmatmul.f32.gmra.mxu0 %v730_v12 }
 0x3cb   :  { %v694_v49 = vpop.f32.mrf.mxu3 }
 0x3cc   :  { %v731_v50 = vadd.f32 %v694_v49, %v658_v46 }
 0x3ce   :  { %784 = vmatmul.f32.gmra.mxu0 %v731_v50 }
 0x3d3   :  { %v696_v9 = vpop.f32.mrf.mxu3 }
 0x3d4   :  { %v732_v47 = vadd.f32 %v696_v9, %v659_v33 }
 0x3d6   :  { %787 = vmatmul.f32.gmra.mxu0 %v732_v47 }
 0x3db   :  { %v699_v28 = vpop.f32.mrf.mxu3 }
 0x3dc   :  { %v733_v19 = vadd.f32 %v699_v28, %v660_v7 }
 0x3de   :  { %790 = vmatmul.f32.gmra.mxu0 %v733_v19 }
 0x3e3   :  { %v701_v48 = vpop.f32.mrf.mxu3 }
 0x3e4   :  { %v734_v39 = vadd.f32 %v701_v48, %v661_v10 }
 0x3e6   :  { %793 = vmatmul.f32.gmra.mxu0 %v734_v39 }
 0x3eb   :  { %v704_v20 = vpop.f32.mrf.mxu3 }
 0x3ec   :  { %v735_v6 = vadd.f32 %v704_v20, %v662_v56 }
 0x3ee   :  { %796 = vmatmul.f32.gmra.mxu0 %v735_v6 }
 0x3f3   :  { %v706_v45 = vpop.f32.mrf.mxu3 }
 0x3f4   :  { %v736_v46 = vadd.f32 %v706_v45, %v663_v18 }
 0x3f6   :  { %799 = vmatmul.f32.gmra.mxu0 %v736_v46 }
 0x3fb   :  { %v709_v32 = vpop.f32.mrf.mxu3 }
 0x3fc   :  { %v737_v16 = vadd.f32 %v709_v32, %v664_v52 }
 0x3fe   :  { %802 = vmatmul.f32.gmra.mxu0 %v737_v16 }
 0x403   :  { %v711_v7 = vpop.f32.mrf.mxu3 }
 0x404   :  { %v738_v13 = vadd.f32 %v711_v7, %v665_v22 }
 0x406   :  { %805 = vmatmul.f32.gmra.mxu0 %v738_v13 }
 0x40b   :  { %v714_v10 = vpop.f32.mrf.mxu3 }
 0x40c   :  { %v739_v15 = vadd.f32 %v714_v10, %v666_v11 }
 0x40e   :  { %808 = vmatmul.f32.gmra.mxu0 %v739_v15 }
 0x413   :  { %v716_v56 = vpop.f32.mrf.mxu3 }
 0x414   :  { %v740_v17 = vadd.f32 %v716_v56, %v667_v31 }
 0x416   :  { %811 = vmatmul.f32.gmra.mxu0 %v740_v17 }
 0x41b   :  { %v719_v18 = vpop.f32.mrf.mxu3 }
 0x41c   :  { %v741_v8 = vadd.f32 %v719_v18, %v668_v43 }
 0x41e   :  { %814 = vmatmul.f32.gmra.mxu0 %v741_v8 }
 0x423   :  { %v721_v52 = vpop.f32.mrf.mxu3 }
 0x424   :  { %v742_v54 = vadd.f32 %v721_v52, %v669_v5 }
 0x426   :  { %817 = vmatmul.f32.gmra.mxu0 %v742_v54 }
 0x42b   :  { %v724_v22 = vpop.f32.mrf.mxu3 }
 0x42c   :  { %v743_v3 = vadd.f32 %v724_v22, %v670_v21 }
 0x42e   :  { %820 = vmatmul.f32.gmra.mxu0 %v743_v3  ;;  %v973_v3 = vld [vmem:[#allocation8 + $0xf8] sm:$0xff] }
 0x42f   :  { %974 = vmatpush.msra.mxu1 %v973_v3 }
 0x433   :  { %v726_v11 = vpop.f32.mrf.mxu3 }
 0x434   :  { %v744_v29 = vadd.f32 %v726_v11, %v671_v57 }
 0x436   :  { %823 = vmatmul.f32.gmra.mxu0 %v744_v29 }
 0x43b   :  { %v2357_v31 = vpop.f32.mrf.mxu0 }
 0x43c   :  { %v848_v26 = vmul.f32 %v2357_v31, %v2357_v31 }
 0x443   :  { %v2359_v60 = vpop.f32.mrf.mxu0 }
 0x444   :  { %v849_v35 = vmul.f32 %v2359_v60, %v2359_v60  ;;  %v827_v41 = vadd.f32 %v2359_v60, %v2357_v31 }
 0x446   :  { %v864_v0 = vadd.f32 %v849_v35, %v848_v26  ;;  %v972_v35 = vld [vmem:[#allocation8 + $0xf0] sm:$0xff] }
 0x447   :  { %975 = vmatpush.msra.mxu1 %v972_v35 }
 0x44b   :  { %v2361_v43 = vpop.f32.mrf.mxu0 }
 0x44c   :  { %v850_v55 = vmul.f32 %v2361_v43, %v2361_v43  ;;  %v828_v44 = vadd.f32 %v827_v41, %v2361_v43 }
 0x44e   :  { %v865_v62 = vadd.f32 %v864_v0, %v850_v55  ;;  %v971_v55 = vld [vmem:[#allocation8 + $0xe8] sm:$0xff] }
 0x44f   :  { %976 = vmatpush.msra.mxu1 %v971_v55 }
 0x453   :  { %v2363_v33 = vpop.f32.mrf.mxu0 }
 0x454   :  { %v851_v34 = vmul.f32 %v2363_v33, %v2363_v33  ;;  %v829_v24 = vadd.f32 %v828_v44, %v2363_v33 }
 0x456   :  { %v866_v25 = vadd.f32 %v865_v62, %v851_v34  ;;  %v970_v34 = vld [vmem:[#allocation8 + $0xe0] sm:$0xff] }
 0x457   :  { %977 = vmatpush.msra.mxu1 %v970_v34 }
 0x45b   :  { %v2365_v61 = vpop.f32.mrf.mxu0 }
 0x45c   :  { %v852_v36 = vmul.f32 %v2365_v61, %v2365_v61  ;;  %v830_v37 = vadd.f32 %v829_v24, %v2365_v61 }
 0x45e   :  { %v867_v2 = vadd.f32 %v866_v25, %v852_v36  ;;  %v969_v36 = vld [vmem:[#allocation8 + $0xd8] sm:$0xff] }
 0x45f   :  { %978 = vmatpush.msra.mxu1 %v969_v36 }
 0x463   :  { %v2367_v5 = vpop.f32.mrf.mxu0 }
 0x464   :  { %v853_v27 = vmul.f32 %v2367_v5, %v2367_v5  ;;  %v831_v63 = vadd.f32 %v830_v37, %v2367_v5 }
 0x466   :  { %v868_v1 = vadd.f32 %v867_v2, %v853_v27  ;;  %v968_v27 = vld [vmem:[#allocation8 + $0xd0] sm:$0xff] }
 0x467   :  { %979 = vmatpush.msra.mxu1 %v968_v27 }
 0x46b   :  { %v2369_v58 = vpop.f32.mrf.mxu0 }
 0x46c   :  { %v854_v53 = vmul.f32 %v2369_v58, %v2369_v58  ;;  %v832_v38 = vadd.f32 %v831_v63, %v2369_v58 }
 0x46e   :  { %v869_v51 = vadd.f32 %v868_v1, %v854_v53  ;;  %v967_v53 = vld [vmem:[#allocation8 + $0xc8] sm:$0xff] }
 0x46f   :  { %980 = vmatpush.msra.mxu1 %v967_v53 }
 0x473   :  { %v2371_v21 = vpop.f32.mrf.mxu0 }
 0x474   :  { %v855_v30 = vmul.f32 %v2371_v21, %v2371_v21  ;;  %v833_v42 = vadd.f32 %v832_v38, %v2371_v21 }
 0x476   :  { %v870_v50 = vadd.f32 %v869_v51, %v855_v30  ;;  %v966_v30 = vld [vmem:[#allocation8 + $0xc0] sm:$0xff] }
 0x477   :  { %981 = vmatpush.msra.mxu1 %v966_v30 }
 0x47b   :  { %v2373_v23 = vpop.f32.mrf.mxu0 }
 0x47c   :  { %v856_v12 = vmul.f32 %v2373_v23, %v2373_v23  ;;  %v834_v49 = vadd.f32 %v833_v42, %v2373_v23 }
 0x47e   :  { %v871_v47 = vadd.f32 %v870_v50, %v856_v12  ;;  %v965_v12 = vld [vmem:[#allocation8 + $0xb8] sm:$0xff] }
 0x47f   :  { %982 = vmatpush.msra.mxu1 %v965_v12 }
 0x483   :  { %v2375_v59 = vpop.f32.mrf.mxu0 }
 0x484   :  { %v857_v9 = vmul.f32 %v2375_v59, %v2375_v59  ;;  %v835_v28 = vadd.f32 %v834_v49, %v2375_v59  ;;  %v964_v49 = vld [vmem:[#allocation8 + $0xb0] sm:$0xff] }
 0x485   :  { %983 = vmatpush.msra.mxu1 %v964_v49 }
 0x486   :  { %v872_v48 = vadd.f32 %v871_v47, %v857_v9  ;;  %v963_v9 = vld [vmem:[#allocation8 + $0xa8] sm:$0xff] }
 0x487   :  { %984 = vmatpush.msra.mxu1 %v963_v9 }
 0x48b   :  { %v2377_v57 = vpop.f32.mrf.mxu0 }
 0x48c   :  { %v858_v19 = vmul.f32 %v2377_v57, %v2377_v57  ;;  %v836_v39 = vadd.f32 %v835_v28, %v2377_v57  ;;  %v962_v28 = vld [vmem:[#allocation8 + $0xa0] sm:$0xff] }
 0x48d   :  { %985 = vmatpush.msra.mxu1 %v962_v28 }
 0x48e   :  { %v873_v45 = vadd.f32 %v872_v48, %v858_v19  ;;  %v961_v48 = vld [vmem:[#allocation8 + $0x98] sm:$0xff] }
 0x48f   :  { %986 = vmatpush.msra.mxu1 %v961_v48 }
 0x493   :  { %v2379_v4 = vpop.f32.mrf.mxu0 }
 0x494   :  { %v859_v20 = vmul.f32 %v2379_v4, %v2379_v4  ;;  %v837_v46 = vadd.f32 %v836_v39, %v2379_v4  ;;  %v960_v39 = vld [vmem:[#allocation8 + $0x90] sm:$0xff] }
 0x495   :  { %987 = vmatpush.msra.mxu1 %v960_v39 }
 0x496   :  { %v874_v16 = vadd.f32 %v873_v45, %v859_v20  ;;  %v959_v20 = vld [vmem:[#allocation8 + $0x88] sm:$0xff]  ;;  %v958_v45 = vld [vmem:[#allocation8 + $0x80] sm:$0xff] }
 0x497   :  { %988 = vmatpush.msra.mxu1 %v959_v20 }
 0x499   :  { %989 = vmatpush.msra.mxu1 %v958_v45 }
 0x49b   :  { %v2392_v40 = vpop.f32.mrf.mxu0 }
 0x49c   :  { %v860_v32 = vmul.f32 %v2392_v40, %v2392_v40  ;;  %v838_v7 = vadd.f32 %v837_v46, %v2392_v40 }
 0x49e   :  { %v875_v10 = vadd.f32 %v874_v16, %v860_v32 }
 0x4a3   :  { %v2406_v14 = vpop.f32.mrf.mxu0 }
 0x4a4   :  { %v861_v13 = vmul.f32 %v2406_v14, %v2406_v14  ;;  %v839_v15 = vadd.f32 %v838_v7, %v2406_v14 }
 0x4a6   :  { %v876_v17 = vadd.f32 %v875_v10, %v861_v13 }
 0x4ab   :  { %v2420_v6 = vpop.f32.mrf.mxu0 }
 0x4ac   :  { %v862_v56 = vmul.f32 %v2420_v6, %v2420_v6  ;;  %v840_v18 = vadd.f32 %v839_v15, %v2420_v6  ;;  %v902_v15 = vld [vmem:[#allocation10 + $0x4] sm:$0x1] }
 0x4ae   :  { %v877_v52 = vadd.f32 %v876_v17, %v862_v56 }
 0x4b3   :  { %v2432_v8 = vpop.f32.mrf.mxu0 }
 0x4b4   :  { %v841_v54 = vadd.f32 %v840_v18, %v2432_v8  ;;  %v863_v22 = vmul.f32 %v2432_v8, %v2432_v8  ;;  %v904_v18 = vld [vmem:[#allocation10 + $0x5] sm:$0x1] }
 0x4b6   :  { %v842_v11 = vrot.slane %v841_v54, 4  ;;  %v878_v29 = vadd.f32 %v877_v52, %v863_v22 }
 0x4b8   :  { %v843_v26 = vadd.f32 %v842_v11, %v841_v54  ;;  %v879_v41 = vrot.slane %v878_v29, 4 }
 0x4ba   :  { %v844_v0 = vrot.slane %v843_v26, 2  ;;  %v880_v44 = vadd.f32 %v879_v41, %v878_v29 }
 0x4bc   :  { %v845_v62 = vadd.f32 %v844_v0, %v843_v26  ;;  %v881_v24 = vrot.slane %v880_v44, 2 }
 0x4be   :  { %v846_v25 = vrot.slane %v845_v62, 1  ;;  %v882_v37 = vadd.f32 %v881_v24, %v880_v44 }
 0x4c0   :  { %v847_v2 = vadd.f32 %v846_v25, %v845_v62  ;;  %v883_v63 = vrot.slane %v882_v37, 1 }
 0x4c2   :  { %v884_v1 = vadd.f32 %v883_v63, %v882_v37  ;;  %v885_v38 = vmul.f32 0.0078125, %v847_v2 }
 0x4c4   :  { %v886_v51 = vmul.f32 0.0078125, %v884_v1  ;;  %v887_v42 = vmul.f32 %v885_v38, %v885_v38 }
 0x4c6   :  { %v888_v50 = vsub.f32 %v886_v51, %v887_v42 }
 0x4c8   :  { %v889_v47 = vmax.f32 %v888_v50, 0.0 }
 0x4ca   :  { %v890_v19 = vadd.f32 1e-05, %v889_v47 }
 0x4cc   :  { %1763 = vrsqrt.f32 %v890_v19  ;;  %vm897_vm7 = vweird.f32 %v890_v19 }
 0x4d2   :  { %v1764_v46 = vpop.eup %1763 }
 0x4d3   :  { %v892_v32 = vmul.f32 %v1764_v46, %v890_v19  ;;  %vm898_vm6 = vweird.f32 %v1764_v46 }
 0x4d4   :  { %vm899_vm8 = vmor %vm897_vm7, %vm898_vm6 }
 0x4d5   :  { %v893_v16 = vmul.f32 %v1764_v46, %v892_v32 }
 0x4d7   :  { %v894_v7 = vmul.f32 0.5, %v893_v16 }
 0x4d9   :  { %v895_v13 = vsub.f32 1.5, %v894_v7 }
 0x4db   :  { %v896_v10 = vmul.f32 %v1764_v46, %v895_v13 }
 0x4dd   :  { %v900_v56 = vsel %vm899_vm8, %v1764_v46, %v896_v10 }
 0x4de   :  { %v903_v17 = vmul.f32 %v902_v15, %v900_v56 }
 0x4e0   :  { %v905_v52 = vmul.f32 %v903_v17, %v885_v38  ;;  %v907_v54 = vperm.slane %v903_v17, 0 }
 0x4e2   :  { %v906_v22 = vsub.f32 %v904_v18, %v905_v52  ;;  %v908_v11 = vmul.f32 %v907_v54, %v2357_v31  ;;  %v916_v35 = vmul.f32 %v907_v54, %v2373_v23  ;;  %v917_v41 = vmul.f32 %v907_v54, %v2375_v59 }
 0x4e3   :  { %v918_v55 = vmul.f32 %v907_v54, %v2377_v57  ;;  %v919_v0 = vmul.f32 %v907_v54, %v2379_v4  ;;  %v923_v44 = vmul.f32 %v907_v54, %v2432_v8  ;;  %v909_v34 = vmul.f32 %v907_v54, %v2359_v60 }
 0x4e4   :  { %v924_v3 = vperm.slane %v906_v22, 0  ;;  %v920_v62 = vmul.f32 %v907_v54, %v2392_v40  ;;  %v921_v23 = vmul.f32 %v907_v54, %v2406_v14  ;;  %v922_v59 = vmul.f32 %v907_v54, %v2420_v6 }
 0x4e5   :  { %v910_v60 = vmul.f32 %v907_v54, %v2361_v43  ;;  %v911_v53 = vmul.f32 %v907_v54, %v2363_v33  ;;  %v912_v14 = vmul.f32 %v907_v54, %v2365_v61  ;;  %v913_v51 = vmul.f32 %v907_v54, %v2367_v5 }
 0x4e6   :  { %v925_v29 = vadd.f32 %v924_v3, %v908_v11  ;;  %v933_v24 = vadd.f32 %v924_v3, %v916_v35  ;;  %v934_v36 = vadd.f32 %v924_v3, %v917_v41  ;;  %v935_v31 = vadd.f32 %v924_v3, %v918_v55 }
 0x4e7   :  { %v936_v25 = vadd.f32 %v924_v3, %v919_v0  ;;  %v937_v37 = vadd.f32 %v924_v3, %v920_v62  ;;  %v940_v27 = vadd.f32 %v924_v3, %v923_v44  ;;  %v926_v57 = vadd.f32 %v924_v3, %v909_v34 }
 0x4e8   :  { %v941_v26 = vmax.f32 %v925_v29, 0.0  ;;  %v938_v2 = vadd.f32 %v924_v3, %v921_v23  ;;  %v939_v4 = vadd.f32 %v924_v3, %v922_v59  ;;  %v927_v8 = vadd.f32 %v924_v3, %v910_v60 }
 0x4e9   :  { %v942_v63 = vmax.f32 %v926_v57, 0.0  ;;  %v928_v1 = vadd.f32 %v924_v3, %v911_v53  ;;  %v929_v30 = vadd.f32 %v924_v3, %v912_v14  ;;  %v930_v42 = vadd.f32 %v924_v3, %v913_v51 }
 0x4ea   :  { %990 = vmatmul.f32.vlgmr.msra.gmra.mxu1 %v941_v26  ;;  %v943_v40 = vmax.f32 %v927_v8, 0.0  ;;  %v914_v43 = vmul.f32 %v907_v54, %v2369_v58  ;;  %v915_v33 = vmul.f32 %v907_v54, %v2371_v21  ;;  %v949_v28 = vmax.f32 %v933_v24, 0.0 }
 0x4eb   :  { %v944_v38 = vmax.f32 %v928_v1, 0.0  ;;  %v945_v6 = vmax.f32 %v929_v30, 0.0  ;;  %v946_v12 = vmax.f32 %v930_v42, 0.0  ;;  %v950_v61 = vmax.f32 %v934_v36, 0.0 }
 0x4ec   :  { %v931_v49 = vadd.f32 %v924_v3, %v914_v43  ;;  %v932_v9 = vadd.f32 %v924_v3, %v915_v33  ;;  %v951_v19 = vmax.f32 %v935_v31, 0.0  ;;  %v952_v5 = vmax.f32 %v936_v25, 0.0 }
 0x4ed   :  { %v953_v48 = vmax.f32 %v937_v37, 0.0  ;;  %v954_v39 = vmax.f32 %v938_v2, 0.0  ;;  %v955_v58 = vmax.f32 %v939_v4, 0.0  ;;  %v956_v20 = vmax.f32 %v940_v27, 0.0 }
 0x4ee   :  { %v947_v50 = vmax.f32 %v931_v49, 0.0  ;;  %v948_v47 = vmax.f32 %v932_v9, 0.0 }
 0x4f2   :  { %993 = vmatmul.f32.gmra.mxu1 %v942_v63 }
 0x4fa   :  { %996 = vmatmul.f32.gmra.mxu1 %v943_v40 }
 0x502   :  { %999 = vmatmul.f32.gmra.mxu1 %v944_v38 }
 0x50a   :  { %1002 = vmatmul.f32.gmra.mxu1 %v945_v6 }
 0x512   :  { %1005 = vmatmul.f32.gmra.mxu1 %v946_v12 }
 0x51a   :  { %1008 = vmatmul.f32.gmra.mxu1 %v947_v50 }
 0x522   :  { %1011 = vmatmul.f32.gmra.mxu1 %v948_v47 }
 0x52a   :  { %1014 = vmatmul.f32.gmra.mxu1 %v949_v28 }
 0x532   :  { %1017 = vmatmul.f32.gmra.mxu1 %v950_v61 }
 0x53a   :  { %1020 = vmatmul.f32.gmra.mxu1 %v951_v19 }
 0x542   :  { %1023 = vmatmul.f32.gmra.mxu1 %v952_v5 }
 0x54a   :  { %1026 = vmatmul.f32.gmra.mxu1 %v953_v48 }
 0x552   :  { %1029 = vmatmul.f32.gmra.mxu1 %v954_v39 }
 0x55a   :  { %1032 = vmatmul.f32.gmra.mxu1 %v955_v58 }
 0x562   :  { %1035 = vmatmul.f32.gmra.mxu1 %v956_v20 }
 0x567   :  { %v2453_v21 = vpop.f32.mrf.mxu1 }
 0x568   :  { %v1060_v54 = vmul.f32 %v2453_v21, %v2453_v21 }
 0x56f   :  { %v2455_v45 = vpop.f32.mrf.mxu1 }
 0x570   :  { %v1061_v52 = vmul.f32 %v2455_v45, %v2455_v45  ;;  %v1039_v22 = vadd.f32 %v2455_v45, %v2453_v21 }
 0x572   :  { %v1076_v11 = vadd.f32 %v1061_v52, %v1060_v54 }
 0x577   :  { %v2457_v46 = vpop.f32.mrf.mxu1 }
 0x578   :  { %v1062_v3 = vmul.f32 %v2457_v46, %v2457_v46  ;;  %v1040_v29 = vadd.f32 %v1039_v22, %v2457_v46 }
 0x57a   :  { %v1077_v41 = vadd.f32 %v1076_v11, %v1062_v3 }
 0x57f   :  { %v2459_v32 = vpop.f32.mrf.mxu1 }
 0x580   :  { %v1063_v35 = vmul.f32 %v2459_v32, %v2459_v32  ;;  %v1041_v55 = vadd.f32 %v1040_v29, %v2459_v32 }
 0x582   :  { %v1078_v44 = vadd.f32 %v1077_v41, %v1063_v35 }
 0x587   :  { %v2461_v16 = vpop.f32.mrf.mxu1 }
 0x588   :  { %v1064_v0 = vmul.f32 %v2461_v16, %v2461_v16  ;;  %v1042_v34 = vadd.f32 %v1041_v55, %v2461_v16 }
 0x58a   :  { %v1079_v24 = vadd.f32 %v1078_v44, %v1064_v0 }
 0x58f   :  { %v2463_v7 = vpop.f32.mrf.mxu1 }
 0x590   :  { %v1065_v62 = vmul.f32 %v2463_v7, %v2463_v7  ;;  %v1043_v36 = vadd.f32 %v1042_v34, %v2463_v7 }
 0x592   :  { %v1080_v25 = vadd.f32 %v1079_v24, %v1065_v62 }
 0x597   :  { %v2465_v13 = vpop.f32.mrf.mxu1 }
 0x598   :  { %v1066_v31 = vmul.f32 %v2465_v13, %v2465_v13  ;;  %v1044_v37 = vadd.f32 %v1043_v36, %v2465_v13 }
 0x59a   :  { %v1081_v27 = vadd.f32 %v1080_v25, %v1066_v31 }
 0x59f   :  { %v2467_v10 = vpop.f32.mrf.mxu1 }
 0x5a0   :  { %v1067_v23 = vmul.f32 %v2467_v10, %v2467_v10  ;;  %v1045_v57 = vadd.f32 %v1044_v37, %v2467_v10 }
 0x5a2   :  { %v1082_v4 = vadd.f32 %v1081_v27, %v1067_v23 }
 0x5a7   :  { %v2469_v15 = vpop.f32.mrf.mxu1 }
 0x5a8   :  { %v1068_v2 = vmul.f32 %v2469_v15, %v2469_v15  ;;  %v1046_v63 = vadd.f32 %v1045_v57, %v2469_v15 }
 0x5aa   :  { %v1083_v8 = vadd.f32 %v1082_v4, %v1068_v2  ;;  %v1113_v4 = vld [vmem:[#allocation10 + $0x6] sm:$0x1] }
 0x5af   :  { %v2471_v56 = vpop.f32.mrf.mxu1 }
 0x5b0   :  { %v1069_v60 = vmul.f32 %v2471_v56, %v2471_v56  ;;  %v1047_v40 = vadd.f32 %v1046_v63, %v2471_v56 }
 0x5b2   :  { %v1084_v1 = vadd.f32 %v1083_v8, %v1069_v60  ;;  %v1115_v8 = vld [vmem:[#allocation10 + $0x7] sm:$0x1] }
 0x5b7   :  { %v2473_v17 = vpop.f32.mrf.mxu1 }
 0x5b8   :  { %v1070_v53 = vmul.f32 %v2473_v17, %v2473_v17  ;;  %v1048_v38 = vadd.f32 %v1047_v40, %v2473_v17 }
 0x5ba   :  { %v1085_v6 = vadd.f32 %v1084_v1, %v1070_v53 }
 0x5bf   :  { %v2475_v18 = vpop.f32.mrf.mxu1 }
 0x5c0   :  { %v1071_v14 = vmul.f32 %v2475_v18, %v2475_v18  ;;  %v1049_v51 = vadd.f32 %v1048_v38, %v2475_v18 }
 0x5c2   :  { %v1086_v12 = vadd.f32 %v1085_v6, %v1071_v14 }
 0x5c7   :  { %v2488_v26 = vpop.f32.mrf.mxu1 }
 0x5c8   :  { %v1072_v42 = vmul.f32 %v2488_v26, %v2488_v26  ;;  %v1050_v43 = vadd.f32 %v1049_v51, %v2488_v26 }
 0x5ca   :  { %v1087_v50 = vadd.f32 %v1086_v12, %v1072_v42 }
 0x5cf   :  { %v2502_v59 = vpop.f32.mrf.mxu1 }
 0x5d0   :  { %v1073_v49 = vmul.f32 %v2502_v59, %v2502_v59  ;;  %v1051_v33 = vadd.f32 %v1050_v43, %v2502_v59 }
 0x5d2   :  { %v1088_v47 = vadd.f32 %v1087_v50, %v1073_v49 }
 0x5d7   :  { %v1033_v30 = vpop.f32.mrf.mxu1 }
 0x5d8   :  { %v1074_v9 = vmul.f32 %v1033_v30, %v1033_v30  ;;  %v1052_v28 = vadd.f32 %v1051_v33, %v1033_v30 }
 0x5da   :  { %v1089_v19 = vadd.f32 %v1088_v47, %v1074_v9 }
 0x5df   :  { %v1036_v61 = vpop.f32.mrf.mxu1 }
 0x5e0   :  { %v1053_v5 = vadd.f32 %v1052_v28, %v1036_v61  ;;  %v1075_v48 = vmul.f32 %v1036_v61, %v1036_v61 }
 0x5e2   :  { %v1054_v39 = vrot.slane %v1053_v5, 4  ;;  %v1090_v58 = vadd.f32 %v1089_v19, %v1075_v48 }
 0x5e4   :  { %v1055_v20 = vadd.f32 %v1054_v39, %v1053_v5  ;;  %v1091_v52 = vrot.slane %v1090_v58, 4 }
 0x5e6   :  { %v1056_v54 = vrot.slane %v1055_v20, 2  ;;  %v1092_v22 = vadd.f32 %v1091_v52, %v1090_v58 }
 0x5e8   :  { %v1057_v3 = vadd.f32 %v1056_v54, %v1055_v20  ;;  %v1093_v11 = vrot.slane %v1092_v22, 2 }
 0x5ea   :  { %v1058_v29 = vrot.slane %v1057_v3, 1  ;;  %v1094_v35 = vadd.f32 %v1093_v11, %v1092_v22 }
 0x5ec   :  { %v1059_v41 = vadd.f32 %v1058_v29, %v1057_v3  ;;  %v1095_v55 = vrot.slane %v1094_v35, 1 }
 0x5ee   :  { %v1096_v0 = vadd.f32 %v1095_v55, %v1094_v35  ;;  %v1097_v44 = vmul.f32 0.0078125, %v1059_v41 }
 0x5f0   :  { %v1098_v34 = vmul.f32 0.0078125, %v1096_v0  ;;  %v1099_v62 = vmul.f32 %v1097_v44, %v1097_v44 }
 0x5f2   :  { %v1100_v24 = vsub.f32 %v1098_v34, %v1099_v62 }
 0x5f4   :  { %v1101_v36 = vmax.f32 %v1100_v24, 0.0 }
 0x5f6   :  { %v1102_v31 = vadd.f32 1e-05, %v1101_v36 }
 0x5f8   :  { %1765 = vrsqrt.f32 %v1102_v31  ;;  %vm1109_vm10 = vweird.f32 %v1102_v31 }
 0x5fe   :  { %v1766_v25 = vpop.eup %1765 }
 0x5ff   :  { %v1104_v37 = vmul.f32 %v1766_v25, %v1102_v31  ;;  %vm1110_vm9 = vweird.f32 %v1766_v25 }
 0x600   :  { %vm1111_vm11 = vmor %vm1109_vm10, %vm1110_vm9 }
 0x601   :  { %v1105_v23 = vmul.f32 %v1766_v25, %v1104_v37 }
 0x603   :  { %v1106_v27 = vmul.f32 0.5, %v1105_v23 }
 0x605   :  { %v1107_v57 = vsub.f32 1.5, %v1106_v27 }
 0x607   :  { %v1108_v2 = vmul.f32 %v1766_v25, %v1107_v57 }
 0x609   :  { %v1112_v63 = vsel %vm1111_vm11, %v1766_v25, %v1108_v2 }
 0x60a   :  { %v1114_v60 = vmul.f32 %v1113_v4, %v1112_v63  ;;  %v1771_v4 = vld [vmem:[#allocation2] sm:$0xff]  ;;  %v1772_v63 = vld [vmem:[#allocation2 + $0x8] sm:$0xff] }
 0x60c   :  { %v1116_v40 = vmul.f32 %v1114_v60, %v1097_v44  ;;  %v1118_v53 = vperm.slane %v1114_v60, 0  ;;  %v1773_v60 = vld [vmem:[#allocation2 + $0x10] sm:$0xff] }
 0x60e   :  { %v1117_v1 = vsub.f32 %v1115_v8, %v1116_v40  ;;  %v1133_v38 = vmul.f32 %v1118_v53, %v1033_v30  ;;  %v1134_v14 = vmul.f32 %v1118_v53, %v1036_v61  ;;  %v1131_v51 = vmul.f32 %v1118_v53, %v2488_v26  ;;  %v1774_v8 = vld [vmem:[#allocation2 + $0x18] sm:$0xff]  ;;  %v1775_v40 = vld [vmem:[#allocation2 + $0x20] sm:$0xff] }
 0x60f   :  { %v1132_v42 = vmul.f32 %v1118_v53, %v2502_v59  ;;  %v1129_v33 = vmul.f32 %v1118_v53, %v2473_v17  ;;  %v1130_v47 = vmul.f32 %v1118_v53, %v2475_v18  ;;  %v1127_v17 = vmul.f32 %v1118_v53, %v2469_v15 }
 0x610   :  { %v1135_v6 = vperm.slane %v1117_v1, 0  ;;  %v1128_v5 = vmul.f32 %v1118_v53, %v2471_v56  ;;  %v1125_v52 = vmul.f32 %v1118_v53, %v2465_v13  ;;  %v1126_v15 = vmul.f32 %v1118_v53, %v2467_v10  ;;  %v1256_v1 = vld [vmem:[#allocation7 + $0x170] sm:$0xff] }
 0x611   :  { %v1123_v29 = vmul.f32 %v1118_v53, %v2461_v16  ;;  %v1124_v13 = vmul.f32 %v1118_v53, %v2463_v7  ;;  %v1121_v44 = vmul.f32 %v1118_v53, %v2457_v46  ;;  %v1122_v16 = vmul.f32 %v1118_v53, %v2459_v32 }
 0x612   :  { %v2525_v12 = vadd.f32 %v1135_v6, %v1133_v38  ;;  %v2527_v43 = vadd.f32 %v1135_v6, %v1134_v14  ;;  %v2529_v49 = vadd.f32 %v1135_v6, %v1131_v51  ;;  %v2531_v50 = vadd.f32 %v1135_v6, %v1132_v42  ;;  %v1255_v38 = vld [vmem:[#allocation7 + $0x168] sm:$0xff]  ;;  %v1254_v14 = vld [vmem:[#allocation7 + $0x160] sm:$0xff]  ;;  %v1252_v42 = vld [vmem:[#allocation7 + $0x150] sm:$0xff] }
 0x613   :  { %v2537_v28 = vadd.f32 %v1135_v6, %v1129_v33  ;;  %v2545_v19 = vadd.f32 %v1135_v6, %v1130_v47  ;;  %v2549_v48 = vadd.f32 %v1135_v6, %v1127_v17  ;;  %v2551_v18 = vadd.f32 %v1135_v6, %v1128_v5  ;;  %v1776_v51 = vld [vmem:[#allocation2 + $0x28] sm:$0xff]  ;;  %v1250_v47 = vld [vmem:[#allocation7 + $0x140] sm:$0xff]  ;;  %v1248_v17 = vld [vmem:[#allocation7 + $0x130] sm:$0xff] }
 0x614   :  { %v1166_v9 = vmax.f32 %v2525_v12, 0.0  ;;  %v1167_v30 = vmax.f32 %v2527_v43, 0.0  ;;  %v1164_v59 = vmax.f32 %v2529_v49, 0.0  ;;  %v1165_v61 = vmax.f32 %v2531_v50, 0.0  ;;  %v1251_v33 = vld [vmem:[#allocation7 + $0x148] sm:$0xff] }
 0x615   :  { %v1162_v58 = vmax.f32 %v2537_v28, 0.0  ;;  %v1163_v20 = vmax.f32 %v2545_v19, 0.0  ;;  %v1160_v56 = vmax.f32 %v2549_v48, 0.0  ;;  %v1161_v54 = vmax.f32 %v2551_v18, 0.0  ;;  %v1247_v5 = vld [vmem:[#allocation7 + $0x128] sm:$0xff] }
 0x616   :  { %v1175_v26 = vpack.c.bf16 %v1167_v30, %v1166_v9  ;;  %v1174_v39 = vpack.c.bf16 %v1165_v61, %v1164_v59  ;;  %v2567_v3 = vadd.f32 %v1135_v6, %v1125_v52  ;;  %v2569_v11 = vadd.f32 %v1135_v6, %v1126_v15  ;;  %v1245_v52 = vld [vmem:[#allocation7 + $0x118] sm:$0xff]  ;;  %v1244_v15 = vld [vmem:[#allocation7 + $0x110] sm:$0xff] }
 0x617   :  { %v1173_v22 = vpack.c.bf16 %v1163_v20, %v1162_v58  ;;  %v1172_v10 = vpack.c.bf16 %v1161_v54, %v1160_v56  ;;  %v2579_v55 = vadd.f32 %v1135_v6, %v1123_v29  ;;  %v2581_v0 = vadd.f32 %v1135_v6, %v1124_v13  ;;  %v1243_v29 = vld [vmem:[#allocation7 + $0x108] sm:$0xff]  ;;  %v1242_v13 = vld [vmem:[#allocation7 + $0x100] sm:$0xff] }
 0x618   :  { %1176 = vmatpush.bf16.msra.mxu2 %v1175_v26  ;;  %v1158_v35 = vmax.f32 %v2567_v3, 0.0  ;;  %v1159_v41 = vmax.f32 %v2569_v11, 0.0  ;;  %v2585_v34 = vadd.f32 %v1135_v6, %v1121_v44  ;;  %v2593_v36 = vadd.f32 %v1135_v6, %v1122_v16  ;;  %v1249_v26 = vld [vmem:[#allocation7 + $0x138] sm:$0xff] }
 0x619   :  { %v1156_v62 = vmax.f32 %v2579_v55, 0.0  ;;  %v1157_v24 = vmax.f32 %v2581_v0, 0.0  ;;  %v1119_v31 = vmul.f32 %v1118_v53, %v2453_v21  ;;  %v1120_v46 = vmul.f32 %v1118_v53, %v2455_v45  ;;  %v1257_v53 = vld [vmem:[#allocation7 + $0x178] sm:$0xff] }
 0x61a   :  { %v1171_v7 = vpack.c.bf16 %v1159_v41, %v1158_v35  ;;  %v1154_v32 = vmax.f32 %v2585_v34, 0.0  ;;  %v1155_v37 = vmax.f32 %v2593_v36, 0.0  ;;  %1258 = vmatpush.msra.mxu3 %v1257_v53 }
 0x61b   :  { %v1170_v25 = vpack.c.bf16 %v1157_v24, %v1156_v62  ;;  %v1136_v23 = vadd.f32 %v1135_v6, %v1119_v31  ;;  %v1137_v27 = vadd.f32 %v1135_v6, %v1120_v46  ;;  %v1253_v6 = vld [vmem:[#allocation7 + $0x158] sm:$0xff] }
 0x61c   :  { %1177 = vmatpush.bf16.msra.mxu2 %v1174_v39  ;;  %v1169_v57 = vpack.c.bf16 %v1155_v37, %v1154_v32  ;;  %1259 = vmatpush.msra.mxu3 %v1256_v1  ;;  %v1246_v39 = vld [vmem:[#allocation7 + $0x120] sm:$0xff] }
 0x61d   :  { %v1152_v21 = vmax.f32 %v1136_v23, 0.0  ;;  %v1153_v2 = vmax.f32 %v1137_v27, 0.0 }
 0x61e   :  { %1260 = vmatpush.msra.mxu3 %v1255_v38 }
 0x61f   :  { %v1168_v45 = vpack.c.bf16 %v1153_v2, %v1152_v21 }
 0x620   :  { %1178 = vmatpush.bf16.msra.mxu2 %v1173_v22  ;;  %1261 = vmatpush.msra.mxu3 %v1254_v14  ;;  %v1777_v22 = vld [vmem:[#allocation2 + $0x30] sm:$0xff] }
 0x622   :  { %1262 = vmatpush.msra.mxu3 %v1253_v6 }
 0x624   :  { %1179 = vmatpush.bf16.msra.mxu2 %v1172_v10  ;;  %1263 = vmatpush.msra.mxu3 %v1252_v42  ;;  %v1778_v10 = vld [vmem:[#allocation2 + $0x38] sm:$0xff] }
 0x626   :  { %1264 = vmatpush.msra.mxu3 %v1251_v33 }
 0x628   :  { %1180 = vmatpush.bf16.msra.mxu2 %v1171_v7  ;;  %1265 = vmatpush.msra.mxu3 %v1250_v47 }
 0x62a   :  { %1266 = vmatpush.msra.mxu3 %v1249_v26 }
 0x62c   :  { %1181 = vmatpush.bf16.msra.mxu2 %v1170_v25  ;;  %1267 = vmatpush.msra.mxu3 %v1248_v17 }
 0x62e   :  { %1268 = vmatpush.msra.mxu3 %v1247_v5 }
 0x630   :  { %1182 = vmatpush.bf16.msra.mxu2 %v1169_v57  ;;  %1269 = vmatpush.msra.mxu3 %v1246_v39 }
 0x632   :  { %1270 = vmatpush.msra.mxu3 %v1245_v52 }
 0x634   :  { %1183 = vmatpush.bf16.msra.mxu2 %v1168_v45  ;;  %1271 = vmatpush.msra.mxu3 %v1244_v15 }
 0x636   :  { %1272 = vmatpush.msra.mxu3 %v1243_v29 }
 0x637   :  { %1184 = vmatmul.bf16.vlgmr.msra.gmra.mxu2 %v1771_v4 }
 0x638   :  { %1273 = vmatpush.msra.mxu3 %v1242_v13 }
 0x647   :  { %1189 = vmatmul.bf16.gmra.mxu2 %v1772_v63 }
 0x657   :  { %1194 = vmatmul.bf16.gmra.mxu2 %v1773_v60 }
 0x667   :  { %1199 = vmatmul.bf16.gmra.mxu2 %v1774_v8 }
 0x677   :  { %1204 = vmatmul.bf16.gmra.mxu2 %v1775_v40 }
 0x687   :  { %1209 = vmatmul.bf16.gmra.mxu2 %v1776_v51 }
 0x697   :  { %1214 = vmatmul.bf16.gmra.mxu2 %v1777_v22 }
 0x6a7   :  { %1219 = vmatmul.bf16.gmra.mxu2 %v1778_v10 }
 0x6ba   :  { %v1185_v44 = vpop.f32.mrf.mxu2 }
 0x6bb   :  { %v1225_v16 = vadd.f32 %v1185_v44, %v1152_v21 }
 0x6bd   :  { %1274 = vmatmul.f32.vlgmr.msra.gmra.mxu3 %v1225_v16 }
 0x6c2   :  { %v1187_v7 = vpop.f32.mrf.mxu2 }
 0x6c3   :  { %v1226_v31 = vadd.f32 %v1187_v7, %v1153_v2 }
 0x6c5   :  { %1277 = vmatmul.f32.gmra.mxu3 %v1226_v31 }
 0x6ca   :  { %v1190_v46 = vpop.f32.mrf.mxu2 }
 0x6cb   :  { %v1227_v25 = vadd.f32 %v1190_v46, %v1154_v32 }
 0x6cd   :  { %1280 = vmatmul.f32.gmra.mxu3 %v1227_v25 }
 0x6d2   :  { %v1192_v23 = vpop.f32.mrf.mxu2 }
 0x6d3   :  { %v1228_v27 = vadd.f32 %v1192_v23, %v1155_v37 }
 0x6d5   :  { %1283 = vmatmul.f32.gmra.mxu3 %v1228_v27 }
 0x6da   :  { %v1195_v57 = vpop.f32.mrf.mxu2 }
 0x6db   :  { %v1229_v45 = vadd.f32 %v1195_v57, %v1156_v62 }
 0x6dd   :  { %1286 = vmatmul.f32.gmra.mxu3 %v1229_v45 }
 0x6e2   :  { %v1197_v21 = vpop.f32.mrf.mxu2 }
 0x6e3   :  { %v1230_v2 = vadd.f32 %v1197_v21, %v1157_v24 }
 0x6e5   :  { %1289 = vmatmul.f32.gmra.mxu3 %v1230_v2 }
 0x6ea   :  { %v1200_v4 = vpop.f32.mrf.mxu2 }
 0x6eb   :  { %v1231_v34 = vadd.f32 %v1200_v4, %v1158_v35 }
 0x6ed   :  { %1292 = vmatmul.f32.gmra.mxu3 %v1231_v34 }
 0x6f2   :  { %v1202_v32 = vpop.f32.mrf.mxu2 }
 0x6f3   :  { %v1232_v36 = vadd.f32 %v1202_v32, %v1159_v41 }
 0x6f5   :  { %1295 = vmatmul.f32.gmra.mxu3 %v1232_v36 }
 0x6fa   :  { %v1205_v37 = vpop.f32.mrf.mxu2 }
 0x6fb   :  { %v1233_v55 = vadd.f32 %v1205_v37, %v1160_v56 }
 0x6fd   :  { %1298 = vmatmul.f32.gmra.mxu3 %v1233_v55 }
 0x702   :  { %v1207_v62 = vpop.f32.mrf.mxu2 }
 0x703   :  { %v1234_v0 = vadd.f32 %v1207_v62, %v1161_v54 }
 0x705   :  { %1301 = vmatmul.f32.gmra.mxu3 %v1234_v0 }
 0x70a   :  { %v1210_v24 = vpop.f32.mrf.mxu2 }
 0x70b   :  { %v1235_v3 = vadd.f32 %v1210_v24, %v1162_v58 }
 0x70d   :  { %1304 = vmatmul.f32.gmra.mxu3 %v1235_v3 }
 0x712   :  { %v1212_v35 = vpop.f32.mrf.mxu2 }
 0x713   :  { %v1236_v11 = vadd.f32 %v1212_v35, %v1163_v20 }
 0x715   :  { %1307 = vmatmul.f32.gmra.mxu3 %v1236_v11 }
 0x71a   :  { %v1215_v41 = vpop.f32.mrf.mxu2 }
 0x71b   :  { %v1237_v48 = vadd.f32 %v1215_v41, %v1164_v59 }
 0x71d   :  { %1310 = vmatmul.f32.gmra.mxu3 %v1237_v48 }
 0x722   :  { %v1217_v56 = vpop.f32.mrf.mxu2 }
 0x723   :  { %v1238_v18 = vadd.f32 %v1217_v56, %v1165_v61 }
 0x725   :  { %1313 = vmatmul.f32.gmra.mxu3 %v1238_v18 }
 0x72a   :  { %v1220_v54 = vpop.f32.mrf.mxu2 }
 0x72b   :  { %v1239_v28 = vadd.f32 %v1220_v54, %v1166_v9 }
 0x72d   :  { %1316 = vmatmul.f32.gmra.mxu3 %v1239_v28  ;;  %v1469_v28 = vld [vmem:[#allocation8 + $0x178] sm:$0xff] }
 0x72e   :  { %1470 = vmatpush.msra.mxu0 %v1469_v28 }
 0x732   :  { %v1222_v58 = vpop.f32.mrf.mxu2 }
 0x733   :  { %v1240_v19 = vadd.f32 %v1222_v58, %v1167_v30 }
 0x735   :  { %1319 = vmatmul.f32.gmra.mxu3 %v1240_v19 }
 0x740   :  { %v2635_v20 = vpop.f32.mrf.mxu3 }
 0x741   :  { %v1344_v53 = vmul.f32 %v2635_v20, %v2635_v20 }
 0x748   :  { %v2637_v49 = vpop.f32.mrf.mxu3 }
 0x749   :  { %v1345_v40 = vmul.f32 %v2637_v49, %v2637_v49  ;;  %v1323_v1 = vadd.f32 %v2637_v49, %v2635_v20 }
 0x74b   :  { %v1360_v14 = vadd.f32 %v1345_v40, %v1344_v53  ;;  %v1468_v40 = vld [vmem:[#allocation8 + $0x170] sm:$0xff] }
 0x74c   :  { %1471 = vmatpush.msra.mxu0 %v1468_v40 }
 0x750   :  { %v2639_v59 = vpop.f32.mrf.mxu3 }
 0x751   :  { %v1346_v38 = vmul.f32 %v2639_v59, %v2639_v59  ;;  %v1324_v6 = vadd.f32 %v1323_v1, %v2639_v59 }
 0x753   :  { %v1361_v33 = vadd.f32 %v1360_v14, %v1346_v38  ;;  %v1467_v38 = vld [vmem:[#allocation8 + $0x168] sm:$0xff] }
 0x754   :  { %1472 = vmatpush.msra.mxu0 %v1467_v38 }
 0x758   :  { %v2641_v63 = vpop.f32.mrf.mxu3 }
 0x759   :  { %v1347_v51 = vmul.f32 %v2641_v63, %v2641_v63  ;;  %v1325_v47 = vadd.f32 %v1324_v6, %v2641_v63 }
 0x75b   :  { %v1362_v17 = vadd.f32 %v1361_v33, %v1347_v51  ;;  %v1466_v51 = vld [vmem:[#allocation8 + $0x160] sm:$0xff] }
 0x75c   :  { %1473 = vmatpush.msra.mxu0 %v1466_v51 }
 0x760   :  { %v2643_v50 = vpop.f32.mrf.mxu3 }
 0x761   :  { %v1348_v26 = vmul.f32 %v2643_v50, %v2643_v50  ;;  %v1326_v5 = vadd.f32 %v1325_v47, %v2643_v50 }
 0x763   :  { %v1363_v52 = vadd.f32 %v1362_v17, %v1348_v26  ;;  %v1465_v26 = vld [vmem:[#allocation8 + $0x158] sm:$0xff] }
 0x764   :  { %1474 = vmatpush.msra.mxu0 %v1465_v26 }
 0x768   :  { %v2645_v61 = vpop.f32.mrf.mxu3 }
 0x769   :  { %v1349_v39 = vmul.f32 %v2645_v61, %v2645_v61  ;;  %v1327_v15 = vadd.f32 %v1326_v5, %v2645_v61 }
 0x76b   :  { %v1364_v29 = vadd.f32 %v1363_v52, %v1349_v39  ;;  %v1464_v39 = vld [vmem:[#allocation8 + $0x150] sm:$0xff] }
 0x76c   :  { %1475 = vmatpush.msra.mxu0 %v1464_v39 }
 0x770   :  { %v2647_v12 = vpop.f32.mrf.mxu3 }
 0x771   :  { %v1350_v22 = vmul.f32 %v2647_v12, %v2647_v12  ;;  %v1328_v13 = vadd.f32 %v1327_v15, %v2647_v12 }
 0x773   :  { %v1365_v16 = vadd.f32 %v1364_v29, %v1350_v22  ;;  %v1463_v22 = vld [vmem:[#allocation8 + $0x148] sm:$0xff] }
 0x774   :  { %1476 = vmatpush.msra.mxu0 %v1463_v22 }
 0x778   :  { %v2649_v9 = vpop.f32.mrf.mxu3 }
 0x779   :  { %v1351_v10 = vmul.f32 %v2649_v9, %v2649_v9  ;;  %v1329_v7 = vadd.f32 %v1328_v13, %v2649_v9 }
 0x77b   :  { %v1366_v46 = vadd.f32 %v1365_v16, %v1351_v10  ;;  %v1462_v10 = vld [vmem:[#allocation8 + $0x140] sm:$0xff] }
 0x77c   :  { %1477 = vmatpush.msra.mxu0 %v1462_v10 }
 0x780   :  { %v2651_v60 = vpop.f32.mrf.mxu3 }
 0x781   :  { %v1352_v31 = vmul.f32 %v2651_v60, %v2651_v60  ;;  %v1330_v25 = vadd.f32 %v1329_v7, %v2651_v60 }
 0x783   :  { %v1367_v27 = vadd.f32 %v1366_v46, %v1352_v31  ;;  %v1461_v31 = vld [vmem:[#allocation8 + $0x138] sm:$0xff] }
 0x784   :  { %1478 = vmatpush.msra.mxu0 %v1461_v31 }
 0x788   :  { %v2653_v43 = vpop.f32.mrf.mxu3 }
 0x789   :  { %v1353_v23 = vmul.f32 %v2653_v43, %v2653_v43  ;;  %v1331_v57 = vadd.f32 %v1330_v25, %v2653_v43  ;;  %v1460_v25 = vld [vmem:[#allocation8 + $0x130] sm:$0xff] }
 0x78a   :  { %1479 = vmatpush.msra.mxu0 %v1460_v25 }
 0x78b   :  { %v1368_v21 = vadd.f32 %v1367_v27, %v1353_v23  ;;  %v1459_v23 = vld [vmem:[#allocation8 + $0x128] sm:$0xff] }
 0x78c   :  { %1480 = vmatpush.msra.mxu0 %v1459_v23 }
 0x790   :  { %v2655_v30 = vpop.f32.mrf.mxu3 }
 0x791   :  { %v1354_v45 = vmul.f32 %v2655_v30, %v2655_v30  ;;  %v1332_v2 = vadd.f32 %v1331_v57, %v2655_v30  ;;  %v1458_v57 = vld [vmem:[#allocation8 + $0x120] sm:$0xff] }
 0x792   :  { %1481 = vmatpush.msra.mxu0 %v1458_v57 }
 0x793   :  { %v1369_v32 = vadd.f32 %v1368_v21, %v1354_v45  ;;  %v1457_v21 = vld [vmem:[#allocation8 + $0x118] sm:$0xff] }
 0x794   :  { %1482 = vmatpush.msra.mxu0 %v1457_v21 }
 0x798   :  { %v2657_v8 = vpop.f32.mrf.mxu3 }
 0x799   :  { %v1355_v4 = vmul.f32 %v2657_v8, %v2657_v8  ;;  %v1333_v36 = vadd.f32 %v1332_v2, %v2657_v8  ;;  %v1456_v2 = vld [vmem:[#allocation8 + $0x110] sm:$0xff] }
 0x79a   :  { %1483 = vmatpush.msra.mxu0 %v1456_v2 }
 0x79b   :  { %v1370_v55 = vadd.f32 %v1369_v32, %v1355_v4  ;;  %v1455_v4 = vld [vmem:[#allocation8 + $0x108] sm:$0xff]  ;;  %v1454_v32 = vld [vmem:[#allocation8 + $0x100] sm:$0xff] }
 0x79c   :  { %1484 = vmatpush.msra.mxu0 %v1455_v4 }
 0x79e   :  { %1485 = vmatpush.msra.mxu0 %v1454_v32 }
 0x7a0   :  { %v2670_v42 = vpop.f32.mrf.mxu3 }
 0x7a1   :  { %v1356_v37 = vmul.f32 %v2670_v42, %v2670_v42  ;;  %v1334_v62 = vadd.f32 %v1333_v36, %v2670_v42 }
 0x7a3   :  { %v1371_v24 = vadd.f32 %v1370_v55, %v1356_v37 }
 0x7a8   :  { %v2684_v44 = vpop.f32.mrf.mxu3 }
 0x7a9   :  { %v1357_v0 = vmul.f32 %v2684_v44, %v2684_v44  ;;  %v1335_v3 = vadd.f32 %v1334_v62, %v2684_v44 }
 0x7ab   :  { %v1372_v11 = vadd.f32 %v1371_v24, %v1357_v0 }
 0x7b0   :  { %v2698_v34 = vpop.f32.mrf.mxu3 }
 0x7b1   :  { %v1358_v35 = vmul.f32 %v2698_v34, %v2698_v34  ;;  %v1336_v41 = vadd.f32 %v1335_v3, %v2698_v34  ;;  %v1398_v3 = vld [vmem:[#allocation10 + $0x8] sm:$0x1] }
 0x7b3   :  { %v1373_v56 = vadd.f32 %v1372_v11, %v1358_v35 }
 0x7b8   :  { %v2710_v48 = vpop.f32.mrf.mxu3 }
 0x7b9   :  { %v1337_v18 = vadd.f32 %v1336_v41, %v2710_v48  ;;  %v1359_v54 = vmul.f32 %v2710_v48, %v2710_v48  ;;  %v1400_v41 = vld [vmem:[#allocation10 + $0x9] sm:$0x1] }
 0x7bb   :  { %v1338_v58 = vrot.slane %v1337_v18, 4  ;;  %v1374_v19 = vadd.f32 %v1373_v56, %v1359_v54 }
 0x7bd   :  { %v1339_v53 = vadd.f32 %v1338_v58, %v1337_v18  ;;  %v1375_v1 = vrot.slane %v1374_v19, 4 }
 0x7bf   :  { %v1340_v14 = vrot.slane %v1339_v53, 2  ;;  %v1376_v6 = vadd.f32 %v1375_v1, %v1374_v19 }
 0x7c1   :  { %v1341_v33 = vadd.f32 %v1340_v14, %v1339_v53  ;;  %v1377_v47 = vrot.slane %v1376_v6, 2 }
 0x7c3   :  { %v1342_v17 = vrot.slane %v1341_v33, 1  ;;  %v1378_v5 = vadd.f32 %v1377_v47, %v1376_v6 }
 0x7c5   :  { %v1343_v52 = vadd.f32 %v1342_v17, %v1341_v33  ;;  %v1379_v15 = vrot.slane %v1378_v5, 1 }
 0x7c7   :  { %v1380_v29 = vadd.f32 %v1379_v15, %v1378_v5  ;;  %v1381_v13 = vmul.f32 0.0078125, %v1343_v52 }
 0x7c9   :  { %v1382_v16 = vmul.f32 0.0078125, %v1380_v29  ;;  %v1383_v7 = vmul.f32 %v1381_v13, %v1381_v13 }
 0x7cb   :  { %v1384_v46 = vsub.f32 %v1382_v16, %v1383_v7 }
 0x7cd   :  { %v1385_v27 = vmax.f32 %v1384_v46, 0.0 }
 0x7cf   :  { %v1386_v45 = vadd.f32 1e-05, %v1385_v27 }
 0x7d1   :  { %1767 = vrsqrt.f32 %v1386_v45  ;;  %vm1393_vm13 = vweird.f32 %v1386_v45 }
 0x7d7   :  { %v1768_v36 = vpop.eup %1767 }
 0x7d8   :  { %v1388_v37 = vmul.f32 %v1768_v36, %v1386_v45  ;;  %vm1394_vm12 = vweird.f32 %v1768_v36 }
 0x7d9   :  { %vm1395_vm14 = vmor %vm1393_vm13, %vm1394_vm12 }
 0x7da   :  { %v1389_v55 = vmul.f32 %v1768_v36, %v1388_v37 }
 0x7dc   :  { %v1390_v62 = vmul.f32 0.5, %v1389_v55 }
 0x7de   :  { %v1391_v0 = vsub.f32 1.5, %v1390_v62 }
 0x7e0   :  { %v1392_v24 = vmul.f32 %v1768_v36, %v1391_v0 }
 0x7e2   :  { %v1396_v35 = vsel %vm1395_vm14, %v1768_v36, %v1392_v24 }
 0x7e3   :  { %v1399_v11 = vmul.f32 %v1398_v3, %v1396_v35 }
 0x7e5   :  { %v1401_v56 = vmul.f32 %v1399_v11, %v1381_v13  ;;  %v1403_v18 = vperm.slane %v1399_v11, 0 }
 0x7e7   :  { %v1402_v54 = vsub.f32 %v1400_v41, %v1401_v56  ;;  %v1419_v28 = vmul.f32 %v1403_v18, %v2710_v48  ;;  %v1404_v19 = vmul.f32 %v1403_v18, %v2635_v20  ;;  %v1412_v38 = vmul.f32 %v1403_v18, %v2651_v60 }
 0x7e8   :  { %v1413_v14 = vmul.f32 %v1403_v18, %v2653_v43  ;;  %v1414_v6 = vmul.f32 %v1403_v18, %v2655_v30  ;;  %v1415_v51 = vmul.f32 %v1403_v18, %v2657_v8  ;;  %v1416_v33 = vmul.f32 %v1403_v18, %v2670_v42 }
 0x7e9   :  { %v1420_v58 = vperm.slane %v1402_v54, 0  ;;  %v1405_v47 = vmul.f32 %v1403_v18, %v2637_v49  ;;  %v1417_v39 = vmul.f32 %v1403_v18, %v2684_v44  ;;  %v1418_v60 = vmul.f32 %v1403_v18, %v2698_v34 }
 0x7ea   :  { %v1406_v8 = vmul.f32 %v1403_v18, %v2639_v59  ;;  %v1407_v49 = vmul.f32 %v1403_v18, %v2641_v63  ;;  %v1408_v10 = vmul.f32 %v1403_v18, %v2643_v50  ;;  %v1409_v34 = vmul.f32 %v1403_v18, %v2645_v61 }
 0x7eb   :  { %v1436_v40 = vadd.f32 %v1420_v58, %v1419_v28  ;;  %v1421_v53 = vadd.f32 %v1420_v58, %v1404_v19  ;;  %v1429_v48 = vadd.f32 %v1420_v58, %v1412_v38  ;;  %v1430_v26 = vadd.f32 %v1420_v58, %v1413_v14 }
 0x7ec   :  { %v1431_v17 = vadd.f32 %v1420_v58, %v1414_v6  ;;  %v1432_v20 = vadd.f32 %v1420_v58, %v1415_v51  ;;  %v1433_v5 = vadd.f32 %v1420_v58, %v1416_v33  ;;  %v1422_v52 = vadd.f32 %v1420_v58, %v1405_v47 }
 0x7ed   :  { %v1437_v1 = vmax.f32 %v1421_v53, 0.0  ;;  %v1434_v43 = vadd.f32 %v1420_v58, %v1417_v39  ;;  %v1435_v15 = vadd.f32 %v1420_v58, %v1418_v60  ;;  %v1423_v42 = vadd.f32 %v1420_v58, %v1406_v8 }
 0x7ee   :  { %v1438_v30 = vmax.f32 %v1422_v52, 0.0  ;;  %v1424_v29 = vadd.f32 %v1420_v58, %v1407_v49  ;;  %v1425_v44 = vadd.f32 %v1420_v58, %v1408_v10  ;;  %v1426_v7 = vadd.f32 %v1420_v58, %v1409_v34 }
 0x7ef   :  { %1486 = vmatmul.f32.vlgmr.msra.gmra.mxu0 %v1437_v1  ;;  %v1439_v22 = vmax.f32 %v1423_v42, 0.0  ;;  %v1410_v59 = vmul.f32 %v1403_v18, %v2647_v12  ;;  %v1411_v63 = vmul.f32 %v1403_v18, %v2649_v9  ;;  %v1445_v57 = vmax.f32 %v1429_v48, 0.0 }
 0x7f0   :  { %v1440_v13 = vmax.f32 %v1424_v29, 0.0  ;;  %v1441_v16 = vmax.f32 %v1425_v44, 0.0  ;;  %v1442_v31 = vmax.f32 %v1426_v7, 0.0  ;;  %v1446_v50 = vmax.f32 %v1430_v26, 0.0 }
 0x7f1   :  { %v1427_v46 = vadd.f32 %v1420_v58, %v1410_v59  ;;  %v1428_v23 = vadd.f32 %v1420_v58, %v1411_v63  ;;  %v1447_v45 = vmax.f32 %v1431_v17, 0.0  ;;  %v1448_v61 = vmax.f32 %v1432_v20, 0.0 }
 0x7f2   :  { %v1449_v21 = vmax.f32 %v1433_v5, 0.0  ;;  %v1450_v2 = vmax.f32 %v1434_v43, 0.0  ;;  %v1451_v12 = vmax.f32 %v1435_v15, 0.0  ;;  %v1452_v4 = vmax.f32 %v1436_v40, 0.0 }
 0x7f3   :  { %v1443_v25 = vmax.f32 %v1427_v46, 0.0  ;;  %v1444_v27 = vmax.f32 %v1428_v23, 0.0 }
 0x7f7   :  { %1489 = vmatmul.f32.gmra.mxu0 %v1438_v30 }
 0x7ff   :  { %1492 = vmatmul.f32.gmra.mxu0 %v1439_v22 }
 0x807   :  { %1495 = vmatmul.f32.gmra.mxu0 %v1440_v13 }
 0x80f   :  { %1498 = vmatmul.f32.gmra.mxu0 %v1441_v16 }
 0x817   :  { %1501 = vmatmul.f32.gmra.mxu0 %v1442_v31 }
 0x81f   :  { %1504 = vmatmul.f32.gmra.mxu0 %v1443_v25 }
 0x827   :  { %1507 = vmatmul.f32.gmra.mxu0 %v1444_v27 }
 0x82f   :  { %1510 = vmatmul.f32.gmra.mxu0 %v1445_v57 }
 0x837   :  { %1513 = vmatmul.f32.gmra.mxu0 %v1446_v50 }
 0x83f   :  { %1516 = vmatmul.f32.gmra.mxu0 %v1447_v45 }
 0x847   :  { %1519 = vmatmul.f32.gmra.mxu0 %v1448_v61 }
 0x84f   :  { %1522 = vmatmul.f32.gmra.mxu0 %v1449_v21 }
 0x857   :  { %1525 = vmatmul.f32.gmra.mxu0 %v1450_v2 }
 0x85f   :  { %1528 = vmatmul.f32.gmra.mxu0 %v1451_v12 }
 0x867   :  { %1531 = vmatmul.f32.gmra.mxu0 %v1452_v4 }
 0x86c   :  { %v2731_v9 = vpop.f32.mrf.mxu0 }
 0x86d   :  { %v1556_v18 = vmul.f32 %v2731_v9, %v2731_v9 }
 0x874   :  { %v2733_v32 = vpop.f32.mrf.mxu0 }
 0x875   :  { %v1557_v56 = vmul.f32 %v2733_v32, %v2733_v32  ;;  %v1535_v54 = vadd.f32 %v2733_v32, %v2731_v9 }
 0x877   :  { %v1572_v58 = vadd.f32 %v1557_v56, %v1556_v18 }
 0x87c   :  { %v2735_v36 = vpop.f32.mrf.mxu0 }
 0x87d   :  { %v1558_v28 = vmul.f32 %v2735_v36, %v2735_v36  ;;  %v1536_v19 = vadd.f32 %v1535_v54, %v2735_v36 }
 0x87f   :  { %v1573_v1 = vadd.f32 %v1572_v58, %v1558_v28 }
 0x884   :  { %v2737_v37 = vpop.f32.mrf.mxu0 }
 0x885   :  { %v1559_v40 = vmul.f32 %v2737_v37, %v2737_v37  ;;  %v1537_v38 = vadd.f32 %v1536_v19, %v2737_v37 }
 0x887   :  { %v1574_v6 = vadd.f32 %v1573_v1, %v1559_v40 }
 0x88c   :  { %v2739_v55 = vpop.f32.mrf.mxu0 }
 0x88d   :  { %v1560_v14 = vmul.f32 %v2739_v55, %v2739_v55  ;;  %v1538_v51 = vadd.f32 %v1537_v38, %v2739_v55 }
 0x88f   :  { %v1575_v47 = vadd.f32 %v1574_v6, %v1560_v14 }
 0x894   :  { %v2741_v62 = vpop.f32.mrf.mxu0 }
 0x895   :  { %v1561_v33 = vmul.f32 %v2741_v62, %v2741_v62  ;;  %v1539_v48 = vadd.f32 %v1538_v51, %v2741_v62 }
 0x897   :  { %v1576_v17 = vadd.f32 %v1575_v47, %v1561_v33 }
 0x89c   :  { %v2743_v0 = vpop.f32.mrf.mxu0 }
 0x89d   :  { %v1562_v26 = vmul.f32 %v2743_v0, %v2743_v0  ;;  %v1540_v20 = vadd.f32 %v1539_v48, %v2743_v0 }
 0x89f   :  { %v1577_v60 = vadd.f32 %v1576_v17, %v1562_v26 }
 0x8a4   :  { %v2745_v24 = vpop.f32.mrf.mxu0 }
 0x8a5   :  { %v1563_v5 = vmul.f32 %v2745_v24, %v2745_v24  ;;  %v1541_v52 = vadd.f32 %v1540_v20, %v2745_v24 }
 0x8a7   :  { %v1578_v15 = vadd.f32 %v1577_v60, %v1563_v5 }
 0x8ac   :  { %v2747_v3 = vpop.f32.mrf.mxu0 }
 0x8ad   :  { %v1564_v43 = vmul.f32 %v2747_v3, %v2747_v3  ;;  %v1542_v30 = vadd.f32 %v1541_v52, %v2747_v3 }
 0x8af   :  { %v1579_v42 = vadd.f32 %v1578_v15, %v1564_v43  ;;  %v1609_v15 = vld [vmem:[#allocation10 + $0xa] sm:$0x1] }
 0x8b4   :  { %v2749_v35 = vpop.f32.mrf.mxu0 }
 0x8b5   :  { %v1565_v8 = vmul.f32 %v2749_v35, %v2749_v35  ;;  %v1543_v22 = vadd.f32 %v1542_v30, %v2749_v35 }
 0x8b7   :  { %v1580_v29 = vadd.f32 %v1579_v42, %v1565_v8  ;;  %v1611_v42 = vld [vmem:[#allocation10 + $0xb] sm:$0x1] }
 0x8bc   :  { %v2751_v11 = vpop.f32.mrf.mxu0 }
 0x8bd   :  { %v1566_v49 = vmul.f32 %v2751_v11, %v2751_v11  ;;  %v1544_v13 = vadd.f32 %v1543_v22, %v2751_v11 }
 0x8bf   :  { %v1581_v16 = vadd.f32 %v1580_v29, %v1566_v49 }
 0x8c4   :  { %v2753_v41 = vpop.f32.mrf.mxu0 }
 0x8c5   :  { %v1567_v10 = vmul.f32 %v2753_v41, %v2753_v41  ;;  %v1545_v34 = vadd.f32 %v1544_v13, %v2753_v41 }
 0x8c7   :  { %v1582_v31 = vadd.f32 %v1581_v16, %v1567_v10 }
 0x8cc   :  { %v2766_v53 = vpop.f32.mrf.mxu0 }
 0x8cd   :  { %v1568_v7 = vmul.f32 %v2766_v53, %v2766_v53  ;;  %v1546_v59 = vadd.f32 %v1545_v34, %v2766_v53 }
 0x8cf   :  { %v1583_v25 = vadd.f32 %v1582_v31, %v1568_v7 }
 0x8d4   :  { %v2780_v39 = vpop.f32.mrf.mxu0 }
 0x8d5   :  { %v1569_v46 = vmul.f32 %v2780_v39, %v2780_v39  ;;  %v1547_v63 = vadd.f32 %v1546_v59, %v2780_v39 }
 0x8d7   :  { %v1584_v27 = vadd.f32 %v1583_v25, %v1569_v46 }
 0x8dc   :  { %v2794_v44 = vpop.f32.mrf.mxu0 }
 0x8dd   :  { %v1570_v23 = vmul.f32 %v2794_v44, %v2794_v44  ;;  %v1548_v57 = vadd.f32 %v1547_v63, %v2794_v44 }
 0x8df   :  { %v1585_v45 = vadd.f32 %v1584_v27, %v1570_v23 }
 0x8e4   :  { %v1532_v50 = vpop.f32.mrf.mxu0 }
 0x8e5   :  { %v1549_v61 = vadd.f32 %v1548_v57, %v1532_v50  ;;  %v1571_v21 = vmul.f32 %v1532_v50, %v1532_v50 }
 0x8e7   :  { %v1550_v2 = vrot.slane %v1549_v61, 4  ;;  %v1586_v12 = vadd.f32 %v1585_v45, %v1571_v21 }
 0x8e9   :  { %v1551_v4 = vadd.f32 %v1550_v2, %v1549_v61  ;;  %v1587_v56 = vrot.slane %v1586_v12, 4 }
 0x8eb   :  { %v1552_v18 = vrot.slane %v1551_v4, 2  ;;  %v1588_v54 = vadd.f32 %v1587_v56, %v1586_v12 }
 0x8ed   :  { %v1553_v28 = vadd.f32 %v1552_v18, %v1551_v4  ;;  %v1589_v58 = vrot.slane %v1588_v54, 2 }
 0x8ef   :  { %v1554_v19 = vrot.slane %v1553_v28, 1  ;;  %v1590_v40 = vadd.f32 %v1589_v58, %v1588_v54 }
 0x8f1   :  { %v1555_v1 = vadd.f32 %v1554_v19, %v1553_v28  ;;  %v1591_v38 = vrot.slane %v1590_v40, 1 }
 0x8f3   :  { %v1592_v14 = vadd.f32 %v1591_v38, %v1590_v40  ;;  %v1593_v6 = vmul.f32 0.0078125, %v1555_v1 }
 0x8f5   :  { %v1594_v51 = vmul.f32 0.0078125, %v1592_v14  ;;  %v1595_v33 = vmul.f32 %v1593_v6, %v1593_v6 }
 0x8f7   :  { %v1596_v47 = vsub.f32 %v1594_v51, %v1595_v33 }
 0x8f9   :  { %v1597_v48 = vmax.f32 %v1596_v47, 0.0 }
 0x8fb   :  { %v1598_v26 = vadd.f32 1e-05, %v1597_v48 }
 0x8fd   :  { %1769 = vrsqrt.f32 %v1598_v26  ;;  %vm1605_vm0 = vweird.f32 %v1598_v26 }
 0x903   :  { %v1770_v17 = vpop.eup %1769 }
 0x904   :  { %v1600_v20 = vmul.f32 %v1770_v17, %v1598_v26  ;;  %vm1606_vm15 = vweird.f32 %v1770_v17 }
 0x905   :  { %vm1607_vm1 = vmor %vm1605_vm0, %vm1606_vm15 }
 0x906   :  { %v1601_v5 = vmul.f32 %v1770_v17, %v1600_v20 }
 0x908   :  { %v1602_v60 = vmul.f32 0.5, %v1601_v5 }
 0x90a   :  { %v1603_v52 = vsub.f32 1.5, %v1602_v60 }
 0x90c   :  { %v1604_v43 = vmul.f32 %v1770_v17, %v1603_v52 }
 0x90e   :  { %v1608_v30 = vsel %vm1607_vm1, %v1770_v17, %v1604_v43 }
 0x90f   :  { %v1610_v8 = vmul.f32 %v1609_v15, %v1608_v30 }
 0x911   :  { %v1612_v22 = vmul.f32 %v1610_v8, %v1593_v6  ;;  %v1614_v49 = vperm.slane %v1610_v8, 0 }
 0x913   :  { %v1613_v29 = vsub.f32 %v1611_v42, %v1612_v22  ;;  %v1630_v13 = vmul.f32 %v1614_v49, %v1532_v50  ;;  %v1615_v16 = vmul.f32 %v1614_v49, %v2731_v9  ;;  %v1616_v34 = vmul.f32 %v1614_v49, %v2733_v32 }
 0x914   :  { %v1617_v7 = vmul.f32 %v1614_v49, %v2735_v36  ;;  %v1618_v59 = vmul.f32 %v1614_v49, %v2737_v37  ;;  %v1619_v25 = vmul.f32 %v1614_v49, %v2739_v55  ;;  %v1620_v27 = vmul.f32 %v1614_v49, %v2741_v62 }
 0x915   :  { %v1631_v10 = vperm.slane %v1613_v29, 0  ;;  %v1621_v50 = vmul.f32 %v1614_v49, %v2743_v0  ;;  %v1622_v9 = vmul.f32 %v1614_v49, %v2745_v24  ;;  %v1623_v36 = vmul.f32 %v1614_v49, %v2747_v3 }
 0x916   :  { %v1624_v55 = vmul.f32 %v1614_v49, %v2749_v35  ;;  %v1625_v21 = vmul.f32 %v1614_v49, %v2751_v11  ;;  %v1626_v0 = vmul.f32 %v1614_v49, %v2753_v41  ;;  %v1627_v24 = vmul.f32 %v1614_v49, %v2766_v53 }
 0x917   :  { %v1647_v31 = vadd.f32 %v1631_v10, %v1630_v13  ;;  %v1632_v46 = vadd.f32 %v1631_v10, %v1615_v16  ;;  %v1633_v63 = vadd.f32 %v1631_v10, %v1616_v34  ;;  %v1634_v23 = vadd.f32 %v1631_v10, %v1617_v7 }
 0x918   :  { %v1635_v57 = vadd.f32 %v1631_v10, %v1618_v59  ;;  %v1636_v45 = vadd.f32 %v1631_v10, %v1619_v25  ;;  %v1637_v32 = vadd.f32 %v1631_v10, %v1620_v27  ;;  %v1638_v37 = vadd.f32 %v1631_v10, %v1621_v50 }
 0x919   :  { %1663 = vst [vmem:[#allocation11 + $0x78] sm:$0xff] %v1647_v31  ;;  %v1639_v61 = vadd.f32 %v1631_v10, %v1622_v9  ;;  %v1640_v62 = vadd.f32 %v1631_v10, %v1623_v36  ;;  %v1641_v2 = vadd.f32 %v1631_v10, %v1624_v55  ;;  %v1642_v12 = vadd.f32 %v1631_v10, %v1625_v21 }
 0x91a   :  { %1648 = vst [vmem:[#allocation11] sm:$0xff] %v1632_v46  ;;  %v1628_v3 = vmul.f32 %v1614_v49, %v2780_v39  ;;  %v1643_v4 = vadd.f32 %v1631_v10, %v1626_v0  ;;  %v1629_v35 = vmul.f32 %v1614_v49, %v2794_v44  ;;  %v1644_v56 = vadd.f32 %v1631_v10, %v1627_v24 }
 0x91b   :  { %1649 = vst [vmem:[#allocation11 + $0x8] sm:$0xff] %v1633_v63 }
 0x91c   :  { %1650 = vst [vmem:[#allocation11 + $0x10] sm:$0xff] %v1634_v23  ;;  %v1645_v18 = vadd.f32 %v1631_v10, %v1628_v3  ;;  %v1646_v11 = vadd.f32 %v1631_v10, %v1629_v35 }
 0x91d   :  { %1651 = vst [vmem:[#allocation11 + $0x18] sm:$0xff] %v1635_v57 }
 0x91e   :  { %1652 = vst [vmem:[#allocation11 + $0x20] sm:$0xff] %v1636_v45 }
 0x91f   :  { %1653 = vst [vmem:[#allocation11 + $0x28] sm:$0xff] %v1637_v32 }
 0x920   :  { %1654 = vst [vmem:[#allocation11 + $0x30] sm:$0xff] %v1638_v37 }
 0x921   :  { %1655 = vst [vmem:[#allocation11 + $0x38] sm:$0xff] %v1639_v61 }
 0x922   :  { %1656 = vst [vmem:[#allocation11 + $0x40] sm:$0xff] %v1640_v62 }
 0x923   :  { %1657 = vst [vmem:[#allocation11 + $0x48] sm:$0xff] %v1641_v2 }
 0x924   :  { %1658 = vst [vmem:[#allocation11 + $0x50] sm:$0xff] %v1642_v12 }
 0x925   :  { %1659 = vst [vmem:[#allocation11 + $0x58] sm:$0xff] %v1643_v4 }
 0x926   :  { %1660 = vst [vmem:[#allocation11 + $0x60] sm:$0xff] %v1644_v56 }
 0x927   :  { %1661 = vst [vmem:[#allocation11 + $0x68] sm:$0xff] %v1645_v18 }
 0x928   :  { %1662 = vst [vmem:[#allocation11 + $0x70] sm:$0xff] %v1646_v11 }
 0x929   :  { %1676 = dma.vmem_to_hbm [thread:$0]  %s1669_s4, 2048, %s1671_s21, [#allocation4], %s1932_s26, %s1932_s26, %s1933_s27  }
 0x92a   :  { %1929 = dma.done.wait [#allocation4], 2048  }
 0x92b   :  { %1930 = vsyncadd [#allocation4], 4294965248 }
 0x92c   :  { %1681 = vsyncpa [#allocation3], 1 }
 0x92d   :  { %1682 = vsyncpa [#allocation6], 1 }
 0x92e   :  { %1683 = vsyncpa [#allocation9], 1 }
 0x92f   :  { %1684 = vsyncpa [#allocation4], 1 }

</bundles_post_ra>
